<compile_context>
chip_gen: v7x
topology: tpu7x:2x2x1
jax: 0.10.0
libtpu: 0.0.40
codegen_flags: <defaults>
</compile_context>

<pallas_src>
import functools

import jax
import jax.numpy as jnp
from jax import lax
from jax.experimental import pallas as pl
from jax.experimental.pallas import tpu as pltpu


# ----------------------------------------------------------------------------
# Fused kernel.
#   grid = (B, num_point_tiles)
#   per-point work on a (tile_n, C) block each step; masked-max / masked-sum
#   accumulators live in VMEM scratch; full epilogue on the last point tile.
# ----------------------------------------------------------------------------
def _fused_kernel(pts_ref, pb_ref, cnt_ref, state_ref,
                  w1m_ref, w2_ref, b2_ref, w3_ref, b3_ref,
                  ws1_ref, bs1_ref, ws2_ref, bs2_ref,
                  wg1s_ref, wg1p_ref, bg1_ref, wg2_ref, bg2_ref,
                  out_ref,
                  max_acc, sum_acc,
                  *, num_masks, hidden, cf, with_activation):
    P = num_masks
    ph = P * hidden
    pcf = P * cf
    sep = cf // 2
    t = pl.program_id(1)

    x16 = pts_ref[0].astype(jnp.bfloat16)            # (tile_n, C)

    # One bf16 matmul: layer-1 of all P PointNets (first P*H lanes) and the
    # mask-replication selector (last P*CF lanes).  Masks are 0/1, selector is
    # 0/1 -> the replicated masks are exact even through bf16.
    z = jnp.dot(x16, w1m_ref[...],
                preferred_element_type=jnp.float32)  # (tile_n, P*H + P*CF)
    h1 = jnp.maximum(z[:, :ph] + pb_ref[0], 0.0)     # per-batch L1 terms added
    mrep = z[:, ph:]                                 # per-object masks, replicated

    # Layer 2: block-diagonal weights -> one (Tn, P*H) @ (P*H, P*CF) matmul.
    h2 = jnp.maximum(
        jnp.dot(h1.astype(jnp.bfloat16), w2_ref[...],
                preferred_element_type=jnp.float32) + b2_ref[...], 0.0)

    tile_max = jnp.max(jnp.where(mrep > 0.5, h2, jnp.float32(-1e30)),
                       axis=0, keepdims=True)                           # (1, P*CF)
    tile_sum = jnp.sum(h2 * mrep, axis=0, keepdims=True)                # (1, P*CF)

    @pl.when(t == 0)
    def _():
        max_acc[...] = jnp.full((1, pcf), -1e30, jnp.float32)
        sum_acc[...] = jnp.zeros((1, pcf), jnp.float32)

    max_acc[...] = jnp.maximum(max_acc[...], tile_max)
    sum_acc[...] = sum_acc[...] + tile_sum

    # Epilogue on the last point tile: pooling fixup + per-object linear +
    # state MLP + global MLP (the concat is folded into split weights).
    @pl.when(t == pl.num_programs(1) - 1)
    def _():
        cnt = cnt_ref[0]                             # (1, P*CF) per-object counts
        has_pts = cnt > 0.5
        mean_pool = sum_acc[...] * jnp.where(has_pts,
                                             1.0 / jnp.maximum(cnt, 1e-6), 0.0)
        max_pool = jnp.where(has_pts, max_acc[...], 0.0)   # empty-mask guard
        ch = lax.broadcasted_iota(jnp.int32, (1, pcf), 1) % cf
        pooled = jnp.where(ch < sep, max_pool, mean_pool)  # max/mean mix per object

        # Per-object final linear (block-diagonal, bf16).
        pcd_feat = (jnp.dot(pooled.astype(jnp.bfloat16), w3_ref[...],
                            preferred_element_type=jnp.float32)
                    + b3_ref[...])                         # (1, P*F)

        # State MLP.
        st = state_ref[0].astype(jnp.bfloat16)             # (1, S)
        hs = jnp.maximum(
            jnp.dot(st, ws1_ref[...], preferred_element_type=jnp.float32)
            + bs1_ref[...], 0.0)
        state_feat = (jnp.dot(hs.astype(jnp.bfloat16), ws2_ref[...],
                              preferred_element_type=jnp.float32)
                      + bs2_ref[...])                      # (1, FS)

        # Global MLP; concat([state_feat, pcd_feat]) folded into split W1.
        hg = jnp.maximum(
            jnp.dot(state_feat.astype(jnp.bfloat16), wg1s_ref[...],
                    preferred_element_type=jnp.float32)
            + jnp.dot(pcd_feat.astype(jnp.bfloat16), wg1p_ref[...],
                      preferred_element_type=jnp.float32)
            + bg1_ref[...], 0.0)
        y = (jnp.dot(hg.astype(jnp.bfloat16), wg2_ref[...],
                     preferred_element_type=jnp.float32) + bg2_ref[...])
        if with_activation:
            y = jax.nn.sigmoid(y)
        out_ref[0] = y


# ----------------------------------------------------------------------------
# One-time parameter preparation (stacking / block-diag / selector fusion).
# ----------------------------------------------------------------------------
def prepare_params(params, num_objs):
    pn = params["pcd_pns"]
    P, cin, H = pn["w1"].shape
    CF = pn["w2"].shape[-1]
    F = pn["w3"].shape[-1]

    # Layer-1 input convention: [mean_xyz(3), xyz - mean_xyz(3), rgb(3), state(S)].
    w1_mean = pn["w1"][:, 0:3]
    w1_xyz = pn["w1"][:, 3:6]
    w1_rgb = pn["w1"][:, 6:9]
    w1_state = pn["w1"][:, 9:]

    C = max(8, ((6 + P + 7) // 8) * 8)   # fused point-channel count (sublane padded)
    PH, PCF = P * H, P * CF

    # Fused layer-1 weight + constant mask-replication selector: (C, P*H + P*CF).
    w1m = jnp.zeros((C, PH + PCF), jnp.float32)
    w1m = w1m.at[0:3, :PH].set(jnp.transpose(w1_xyz, (1, 0, 2)).reshape(3, PH))
    w1m = w1m.at[3:6, :PH].set(jnp.transpose(w1_rgb, (1, 0, 2)).reshape(3, PH))
    sel = ((jnp.arange(PCF)[None, :] // CF) == jnp.arange(P)[:, None])
    w1m = w1m.at[6:6 + P, PH:].set(sel.astype(jnp.float32))

    def block_diag(ws):                  # (P, A, B) -> (P*A, P*B)
        p_, a, b_ = ws.shape
        out = jnp.zeros((p_ * a, p_ * b_), ws.dtype)
        for p in range(p_):
            out = out.at[p * a:(p + 1) * a, p * b_:(p + 1) * b_].set(ws[p])
        return out

    sm, gm = params["state_mlp"], params["global_mlp"]
    FS = sm["w2"].shape[-1]
    return {
        "P": P, "H": H, "CF": CF, "F": F, "C": C,
        "w1m": w1m.astype(jnp.bfloat16),
        "w2_bd": block_diag(pn["w2"]).astype(jnp.bfloat16),
        "b2": jnp.transpose(pn["b2"], (1, 0, 2)).reshape(1, PCF),
        "w3_bd": block_diag(pn["w3"]).astype(jnp.bfloat16),
        "b3": jnp.transpose(pn["b3"], (1, 0, 2)).reshape(1, P * F),
        "w1_mean": w1_mean, "w1_xyz": w1_xyz, "w1_state": w1_state, "b1": pn["b1"],
        "ws1": sm["w1"].astype(jnp.bfloat16), "bs1": sm["b1"],
        "ws2": sm["w2"].astype(jnp.bfloat16), "bs2": sm["b2"],
        "wg1s": gm["w1"][:FS].astype(jnp.bfloat16),
        "wg1p": gm["w1"][FS:].astype(jnp.bfloat16),
        "bg1": gm["b1"],
        "wg2": gm["w2"].astype(jnp.bfloat16), "bg2": gm["b2"],
    }


# ----------------------------------------------------------------------------
# Top-level forward: mirrors SparseUnetWithInstanceInfoV0.forward (attn=None).
# ----------------------------------------------------------------------------
def sparse_unet_forward(data, prep, *, num_objs, mask_dim,
                        with_activation=False, tile_n=2048):
    pc = data["pc"]                       # (B, N, 6 + mask_dim)
    state = data["state"]                 # (B, S)
    B, N, _ = pc.shape
    S = state.shape[-1]
    P, H, CF, F, C = prep["P"], prep["H"], prep["CF"], prep["F"], prep["C"]
    HS = prep["ws1"].shape[-1]
    FS = prep["ws2"].shape[-1]
    GH = prep["wg2"].shape[0]
    FOUT = prep["wg2"].shape[-1]
    PH, PCF, PF = P * H, P * CF, P * F

    xyz = pc[:, :, :3]
    rgb = pc[:, :, 3:6]
    seg = pc[:, :, 6:6 + mask_dim]

    # Object masks: [background, obj_0 .. obj_{M-1}, all points]  -> (B, N, P)
    bg = 1.0 - (jnp.sum(seg, axis=-1) > 0.5).astype(pc.dtype)
    masks = jnp.concatenate([bg[..., None], seg, jnp.ones_like(bg[..., None])],
                            axis=-1)

    # Cheap XLA pre-pass: per-object point counts and masked-mean coordinates.
    counts = jnp.sum(masks, axis=1)                                          # (B, P)
    mean_xyz = (jnp.einsum("bnp,bnc->bpc", masks, xyz)
                / jnp.maximum(counts, 1e-6)[..., None])                       # (B, P, 3)
    # The last object's mask is all-ones -> its mean is the full-cloud centroid.
    centroid = mean_xyz[:, P - 1]                                             # (B, 3)

    # Per-batch, per-object part of conv layer 1 (mean / centroid / state / bias),
    # with xyz centered per batch before the bf16 cast for precision.
    pb = (jnp.einsum("bpc,pch->bph", mean_xyz, prep["w1_mean"] - prep["w1_xyz"])
          + jnp.einsum("bc,pch->bph", centroid, prep["w1_xyz"])
          + jnp.einsum("bs,psh->bph", state, prep["w1_state"])
          + jnp.transpose(prep["b1"], (1, 0, 2)))                             # (B, P, H)
    pb = pb.reshape(B, 1, PH)
    cnt_rep = jnp.repeat(counts, CF, axis=-1).reshape(B, 1, PCF)

    # Point tiling (second-to-last dim of the block, multiples of 128).
    tn = max(128, min(int(tile_n), pl.cdiv(N, 128) * 128))
    tn = (tn // 128) * 128
    n_pad = pl.cdiv(N, tn) * tn
    n_tiles = n_pad // tn

    # Fused per-point tensor in ONE concatenate + ONE pad:
    #   [xyz - centroid | rgb | P masks | zero pad]  (padded rows keep zero masks)
    fused = jnp.concatenate([xyz - centroid[:, None, :], rgb, masks], axis=-1)
    pts = jnp.pad(fused, ((0, 0), (0, n_pad - N), (0, C - (6 + P))))

    kernel = functools.partial(_fused_kernel, num_masks=P, hidden=H, cf=CF,
                               with_activation=with_activation)
    const2 = lambda b, t: (0, 0)
    out = pl.pallas_call(
        kernel,
        out_shape=jax.ShapeDtypeStruct((B, 1, FOUT), jnp.float32),
        grid=(B, n_tiles),
        in_specs=[
            pl.BlockSpec((1, tn, C), lambda b, t: (b, t, 0)),        # points
            pl.BlockSpec((1, 1, PH), lambda b, t: (b, 0, 0)),        # per-batch L1 term
            pl.BlockSpec((1, 1, PCF), lambda b, t: (b, 0, 0)),       # per-block counts
            pl.BlockSpec((1, 1, S), lambda b, t: (b, 0, 0)),         # state
            pl.BlockSpec((C, PH + PCF), const2),                     # W1 + mask selector (bf16)
            pl.BlockSpec((PH, PCF), const2),                         # W2 (block-diag, bf16)
            pl.BlockSpec((1, PCF), const2),                          # b2
            pl.BlockSpec((PCF, PF), const2),                         # W3 (block-diag, bf16)
            pl.BlockSpec((1, PF), const2),                           # b3
            pl.BlockSpec((S, HS), const2),                           # state-MLP W1 (bf16)
            pl.BlockSpec((1, HS), const2),
            pl.BlockSpec((HS, FS), const2),                          # state-MLP W2 (bf16)
            pl.BlockSpec((1, FS), const2),
            pl.BlockSpec((FS, GH), const2),                          # global-MLP W1 (state rows)
            pl.BlockSpec((PF, GH), const2),                          # global-MLP W1 (pcd rows)
            pl.BlockSpec((1, GH), const2),
            pl.BlockSpec((GH, FOUT), const2),                        # global-MLP W2
            pl.BlockSpec((1, FOUT), const2),
        ],
        out_specs=pl.BlockSpec((1, 1, FOUT), lambda b, t: (b, 0, 0)),
        scratch_shapes=[pltpu.VMEM((1, PCF), jnp.float32),           # masked-max acc
                        pltpu.VMEM((1, PCF), jnp.float32)],          # masked-sum acc
        compiler_params=pltpu.CompilerParams(
            dimension_semantics=("parallel", "arbitrary"),
            vmem_limit_bytes=48 * 1024 * 1024),
    )(pts, pb, cnt_rep, state.reshape(B, 1, S),
      prep["w1m"], prep["w2_bd"], prep["b2"], prep["w3_bd"], prep["b3"],
      prep["ws1"], prep["bs1"], prep["ws2"], prep["bs2"],
      prep["wg1s"], prep["wg1p"], prep["bg1"], prep["wg2"], prep["bg2"])
    return out.reshape(B, FOUT)


# ----------------------------------------------------------------------------
# Deterministic synthetic parameters.
# ----------------------------------------------------------------------------
def init_params(key, num_objs, state_dim, *, hidden=32, cf=32, f_pcd=32,
                f_state=32, state_hidden=32, g_hidden=64, f_out=40):
    P = num_objs + 2
    cin = 9 + state_dim                  # [mean_xyz, xyz - mean_xyz, rgb, state]
    ks = jax.random.split(key, 14)

    def w(k, shape, scale=0.1):
        return scale * jax.random.normal(k, shape, jnp.float32)

    g_in = f_state + P * f_pcd
    return {
        "pcd_pns": {
            "w1": w(ks[0], (P, cin, hidden)),
            "b1": w(ks[1], (P, 1, hidden), 0.01),
            "w2": w(ks[2], (P, hidden, cf)),
            "b2": w(ks[3], (P, 1, cf), 0.01),
            "w3": w(ks[4], (P, cf, f_pcd)),
            "b3": w(ks[5], (P, 1, f_pcd), 0.01),
        },
        "state_mlp": {
            "w1": w(ks[6], (state_dim, state_hidden)),
            "b1": w(ks[7], (1, state_hidden), 0.01),
            "w2": w(ks[8], (state_hidden, f_state)),
            "b2": w(ks[9], (1, f_state), 0.01),
        },
        "global_mlp": {
            "w1": w(ks[10], (g_in, g_hidden)),
            "b1": w(ks[11], (1, g_hidden), 0.01),
            "w2": w(ks[12], (g_hidden, f_out)),
            "b2": w(ks[13], (1, f_out), 0.01),
        },
    }


if __name__ == "__main__":
    key = jax.random.PRNGKey(0)
    B, N = 2, 512
    num_objs = 2                 # mask_dim == num_objs
    state_dim = 8

    k_xyz, k_rgb, k_lab, k_state, k_par = jax.random.split(key, 5)
    xyz = jax.random.normal(k_xyz, (B, N, 3), jnp.float32)
    rgb = jax.random.uniform(k_rgb, (B, N, 3), jnp.float32)
    # each point belongs to obj 0 / obj 1 / background
    labels = jax.random.randint(k_lab, (B, N), 0, num_objs + 1)
    seg = jnp.stack([(labels == i).astype(jnp.float32) for i in range(num_objs)],
                    axis=-1)
    pc = jnp.concatenate([xyz, rgb, seg], axis=-1)          # (B, N, 6 + num_objs)
    state = jax.random.normal(k_state, (B, state_dim), jnp.float32)

    params = init_params(k_par, num_objs, state_dim)
    prep = prepare_params(params, num_objs)

    out = sparse_unet_forward({"pc": pc, "state": state}, prep,
                              num_objs=num_objs, mask_dim=num_objs,
                              with_activation=False, tile_n=2048)
    out = jax.block_until_ready(out)
    assert out.shape == (B, 40) and out.dtype == jnp.float32
    assert bool(jnp.all(jnp.isfinite(out)))
    print("KERNEL_OK")
</pallas_src>

<mosaic_0001>
module attributes {stable_mosaic.version = 11 : i64} {
  func.func @_fused_kernel(%arg0: i32, %arg1: i32, %arg2: memref<1x512x16xf32, #tpu.memory_space<vmem>>, %arg3: memref<1x1x128xf32, #tpu.memory_space<vmem>>, %arg4: memref<1x1x128xf32, #tpu.memory_space<vmem>>, %arg5: memref<1x1x8xf32, #tpu.memory_space<vmem>>, %arg6: memref<16x256xbf16, #tpu.memory_space<vmem>>, %arg7: memref<128x128xbf16, #tpu.memory_space<vmem>>, %arg8: memref<1x128xf32, #tpu.memory_space<vmem>>, %arg9: memref<128x128xbf16, #tpu.memory_space<vmem>>, %arg10: memref<1x128xf32, #tpu.memory_space<vmem>>, %arg11: memref<8x32xbf16, #tpu.memory_space<vmem>>, %arg12: memref<1x32xf32, #tpu.memory_space<vmem>>, %arg13: memref<32x32xbf16, #tpu.memory_space<vmem>>, %arg14: memref<1x32xf32, #tpu.memory_space<vmem>>, %arg15: memref<32x64xbf16, #tpu.memory_space<vmem>>, %arg16: memref<128x64xbf16, #tpu.memory_space<vmem>>, %arg17: memref<1x64xf32, #tpu.memory_space<vmem>>, %arg18: memref<64x40xbf16, #tpu.memory_space<vmem>>, %arg19: memref<1x40xf32, #tpu.memory_space<vmem>>, %arg20: memref<1x1x40xf32, #tpu.memory_space<vmem>>, %arg21: memref<1x128xf32, #tpu.memory_space<vmem>>, %arg22: memref<1x128xf32, #tpu.memory_space<vmem>>) attributes {dimension_semantics = [#tpu.dimension_semantics<parallel>, #tpu.dimension_semantics<arbitrary>], iteration_bounds = array<i64: 2, 1>, scalar_prefetch = 0 : i64, scratch_operands = 2 : i64, tpu.core_type = #tpu.core_type<tc>, window_params = [{transform_indices = @transform_0, window_bounds = array<i64: 1, 512, 16>}, {transform_indices = @transform_1, window_bounds = array<i64: 1, 1, 128>}, {transform_indices = @transform_2, window_bounds = array<i64: 1, 1, 128>}, {transform_indices = @transform_3, window_bounds = array<i64: 1, 1, 8>}, {pipeline_mode = #tpu.pipeline_mode<synchronous>, transform_indices = @transform_4, window_bounds = array<i64: 16, 256>}, {pipeline_mode = #tpu.pipeline_mode<synchronous>, transform_indices = @transform_5, window_bounds = array<i64: 128, 128>}, {pipeline_mode = #tpu.pipeline_mode<synchronous>, transform_indices = @transform_6, window_bounds = array<i64: 1, 128>}, {pipeline_mode = #tpu.pipeline_mode<synchronous>, transform_indices = @transform_7, window_bounds = array<i64: 128, 128>}, {pipeline_mode = #tpu.pipeline_mode<synchronous>, transform_indices = @transform_8, window_bounds = array<i64: 1, 128>}, {pipeline_mode = #tpu.pipeline_mode<synchronous>, transform_indices = @transform_9, window_bounds = array<i64: 8, 32>}, {pipeline_mode = #tpu.pipeline_mode<synchronous>, transform_indices = @transform_10, window_bounds = array<i64: 1, 32>}, {pipeline_mode = #tpu.pipeline_mode<synchronous>, transform_indices = @transform_11, window_bounds = array<i64: 32, 32>}, {pipeline_mode = #tpu.pipeline_mode<synchronous>, transform_indices = @transform_12, window_bounds = array<i64: 1, 32>}, {pipeline_mode = #tpu.pipeline_mode<synchronous>, transform_indices = @transform_13, window_bounds = array<i64: 32, 64>}, {pipeline_mode = #tpu.pipeline_mode<synchronous>, transform_indices = @transform_14, window_bounds = array<i64: 128, 64>}, {pipeline_mode = #tpu.pipeline_mode<synchronous>, transform_indices = @transform_15, window_bounds = array<i64: 1, 64>}, {pipeline_mode = #tpu.pipeline_mode<synchronous>, transform_indices = @transform_16, window_bounds = array<i64: 64, 40>}, {pipeline_mode = #tpu.pipeline_mode<synchronous>, transform_indices = @transform_17, window_bounds = array<i64: 1, 40>}, {transform_indices = @transform_18, window_bounds = array<i64: 1, 1, 40>}]} {
    %c0 = arith.constant 0 : index
    %c0_0 = arith.constant 0 : index
    %c0_1 = arith.constant 0 : index
    %0 = vector.load %arg2[%c0, %c0_0, %c0_1] : memref<1x512x16xf32, #tpu.memory_space<vmem>>, vector<1x512x16xf32>
    %1 = vector.shape_cast %0 : vector<1x512x16xf32> to vector<512x16xf32>
    %2 = arith.truncf %1 : vector<512x16xf32> to vector<512x16xbf16>
    %c0_2 = arith.constant 0 : index
    %c0_3 = arith.constant 0 : index
    %3 = vector.load %arg6[%c0_2, %c0_3] : memref<16x256xbf16, #tpu.memory_space<vmem>>, vector<16x256xbf16>
    %cst = arith.constant dense<0.000000e+00> : vector<512x256xf32>
    %4 = tpu.matmul %2, %3, %cst {dimension_numbers = #tpu.dot_dimension_numbers<[1], [0], [0], [1], [0, 0, 1, 1], [], []>} : vector<512x16xbf16>, vector<16x256xbf16>, vector<512x256xf32> -> vector<512x256xf32>
    %5 = vector.extract_strided_slice %4 {offsets = [0, 0], sizes = [512, 128], strides = [1, 1]} : vector<512x256xf32> to vector<512x128xf32>
    %c0_4 = arith.constant 0 : index
    %c0_5 = arith.constant 0 : index
    %c0_6 = arith.constant 0 : index
    %6 = vector.load %arg3[%c0_4, %c0_5, %c0_6] : memref<1x1x128xf32, #tpu.memory_space<vmem>>, vector<1x1x128xf32>
    %7 = vector.shape_cast %6 : vector<1x1x128xf32> to vector<1x128xf32>
    %8 = vector.broadcast %7 : vector<1x128xf32> to vector<512x128xf32>
    %9 = arith.addf %5, %8 : vector<512x128xf32>
    %cst_7 = arith.constant 0.000000e+00 : f32
    %10 = vector.broadcast %cst_7 : f32 to vector<512x128xf32>
    %11 = arith.maximumf %9, %10 : vector<512x128xf32>
    %12 = vector.extract_strided_slice %4 {offsets = [0, 128], sizes = [512, 128], strides = [1, 1]} : vector<512x256xf32> to vector<512x128xf32>
    %13 = arith.truncf %11 : vector<512x128xf32> to vector<512x128xbf16>
    %c0_8 = arith.constant 0 : index
    %c0_9 = arith.constant 0 : index
    %14 = vector.load %arg7[%c0_8, %c0_9] : memref<128x128xbf16, #tpu.memory_space<vmem>>, vector<128x128xbf16>
    %cst_10 = arith.constant dense<0.000000e+00> : vector<512x128xf32>
    %15 = tpu.matmul %13, %14, %cst_10 {dimension_numbers = #tpu.dot_dimension_numbers<[1], [0], [0], [1], [0, 0, 1, 1], [], []>} : vector<512x128xbf16>, vector<128x128xbf16>, vector<512x128xf32> -> vector<512x128xf32>
    %c0_11 = arith.constant 0 : index
    %c0_12 = arith.constant 0 : index
    %16 = vector.load %arg8[%c0_11, %c0_12] : memref<1x128xf32, #tpu.memory_space<vmem>>, vector<1x128xf32>
    %17 = vector.broadcast %16 : vector<1x128xf32> to vector<512x128xf32>
    %18 = arith.addf %15, %17 : vector<512x128xf32>
    %cst_13 = arith.constant 0.000000e+00 : f32
    %19 = vector.broadcast %cst_13 : f32 to vector<512x128xf32>
    %20 = arith.maximumf %18, %19 : vector<512x128xf32>
    %cst_14 = arith.constant 5.000000e-01 : f32
    %21 = vector.broadcast %cst_14 : f32 to vector<512x128xf32>
    %22 = arith.cmpf ogt, %12, %21 : vector<512x128xf32>
    %cst_15 = arith.constant -1.000000e+30 : f32
    %23 = vector.broadcast %cst_15 : f32 to vector<512x128xf32>
    %24 = arith.select %22, %20, %23 : vector<512x128xi1>, vector<512x128xf32>
    %cst_16 = arith.constant dense<0xFF800000> : vector<128xf32>
    %25 = vector.multi_reduction <maximumf>, %24, %cst_16 [0] : vector<512x128xf32> to vector<128xf32>
    %26 = vector.shape_cast %25 : vector<128xf32> to vector<1x128xf32>
    %27 = arith.mulf %20, %12 : vector<512x128xf32>
    %cst_17 = arith.constant dense<0.000000e+00> : vector<128xf32>
    %28 = vector.multi_reduction <add>, %27, %cst_17 [0] : vector<512x128xf32> to vector<128xf32>
    %29 = vector.shape_cast %28 : vector<128xf32> to vector<1x128xf32>
    %c0_i32 = arith.constant 0 : i32
    %30 = arith.cmpi eq, %arg1, %c0_i32 : i32
    %31 = arith.extui %30 : i1 to i32
    %c0_i32_18 = arith.constant 0 : i32
    %32 = arith.cmpi ne, %31, %c0_i32_18 : i32
    scf.if %32 {
      %cst_29 = arith.constant -1.000000e+30 : f32
      %42 = vector.broadcast %cst_29 : f32 to vector<1x128xf32>
      %c0_30 = arith.constant 0 : index
      %c0_31 = arith.constant 0 : index
      %43 = vector.load %arg21[%c0_30, %c0_31] : memref<1x128xf32, #tpu.memory_space<vmem>>, vector<1x128xf32>
      tpu.vector_store %arg21[%c0_30, %c0_31], %42 {strides = array<i32>} : memref<1x128xf32, #tpu.memory_space<vmem>>, vector<1x128xf32>,
      %cst_32 = arith.constant 0.000000e+00 : f32
      %44 = vector.broadcast %cst_32 : f32 to vector<1x128xf32>
      %c0_33 = arith.constant 0 : index
      %c0_34 = arith.constant 0 : index
      %45 = vector.load %arg22[%c0_33, %c0_34] : memref<1x128xf32, #tpu.memory_space<vmem>>, vector<1x128xf32>
      tpu.vector_store %arg22[%c0_33, %c0_34], %44 {strides = array<i32>} : memref<1x128xf32, #tpu.memory_space<vmem>>, vector<1x128xf32>,
    } else {
    }
    %c0_19 = arith.constant 0 : index
    %c0_20 = arith.constant 0 : index
    %33 = vector.load %arg21[%c0_19, %c0_20] : memref<1x128xf32, #tpu.memory_space<vmem>>, vector<1x128xf32>
    %34 = arith.maximumf %33, %26 : vector<1x128xf32>
    %c0_21 = arith.constant 0 : index
    %c0_22 = arith.constant 0 : index
    %35 = vector.load %arg21[%c0_21, %c0_22] : memref<1x128xf32, #tpu.memory_space<vmem>>, vector<1x128xf32>
    tpu.vector_store %arg21[%c0_21, %c0_22], %34 {strides = array<i32>} : memref<1x128xf32, #tpu.memory_space<vmem>>, vector<1x128xf32>,
    %c0_23 = arith.constant 0 : index
    %c0_24 = arith.constant 0 : index
    %36 = vector.load %arg22[%c0_23, %c0_24] : memref<1x128xf32, #tpu.memory_space<vmem>>, vector<1x128xf32>
    %37 = arith.addf %36, %29 : vector<1x128xf32>
    %c0_25 = arith.constant 0 : index
    %c0_26 = arith.constant 0 : index
    %38 = vector.load %arg22[%c0_25, %c0_26] : memref<1x128xf32, #tpu.memory_space<vmem>>, vector<1x128xf32>
    tpu.vector_store %arg22[%c0_25, %c0_26], %37 {strides = array<i32>} : memref<1x128xf32, #tpu.memory_space<vmem>>, vector<1x128xf32>,
    %c0_i32_27 = arith.constant 0 : i32
    %39 = arith.cmpi eq, %arg1, %c0_i32_27 : i32
    %40 = arith.extui %39 : i1 to i32
    %c0_i32_28 = arith.constant 0 : i32
    %41 = arith.cmpi ne, %40, %c0_i32_28 : i32
    scf.if %41 {
      %c0_29 = arith.constant 0 : index
      %c0_30 = arith.constant 0 : index
      %c0_31 = arith.constant 0 : index
      %42 = vector.load %arg4[%c0_29, %c0_30, %c0_31] : memref<1x1x128xf32, #tpu.memory_space<vmem>>, vector<1x1x128xf32>
      %43 = vector.shape_cast %42 : vector<1x1x128xf32> to vector<1x128xf32>
      %cst_32 = arith.constant 5.000000e-01 : f32
      %44 = vector.broadcast %cst_32 : f32 to vector<1x128xf32>
      %45 = arith.cmpf ogt, %43, %44 : vector<1x128xf32>
      %c0_33 = arith.constant 0 : index
      %c0_34 = arith.constant 0 : index
      %46 = vector.load %arg22[%c0_33, %c0_34] : memref<1x128xf32, #tpu.memory_space<vmem>>, vector<1x128xf32>
      %cst_35 = arith.constant 9.99999997E-7 : f32
      %47 = vector.broadcast %cst_35 : f32 to vector<1x128xf32>
      %48 = arith.maximumf %43, %47 : vector<1x128xf32>
      %cst_36 = arith.constant 1.000000e+00 : f32
      %49 = vector.broadcast %cst_36 : f32 to vector<1x128xf32>
      %50 = arith.divf %49, %48 : vector<1x128xf32>
      %cst_37 = arith.constant 0.000000e+00 : f32
      %51 = vector.broadcast %cst_37 : f32 to vector<1x128xf32>
      %52 = arith.select %45, %50, %51 : vector<1x128xi1>, vector<1x128xf32>
      %53 = arith.mulf %46, %52 : vector<1x128xf32>
      %c0_38 = arith.constant 0 : index
      %c0_39 = arith.constant 0 : index
      %54 = vector.load %arg21[%c0_38, %c0_39] : memref<1x128xf32, #tpu.memory_space<vmem>>, vector<1x128xf32>
      %cst_40 = arith.constant 0.000000e+00 : f32
      %55 = vector.broadcast %cst_40 : f32 to vector<1x128xf32>
      %56 = arith.select %45, %54, %55 : vector<1x128xi1>, vector<1x128xf32>
      %57 = tpu.iota {dimensions = array<i32: 1>} : vector<1x128xi32>
      %c32_i32 = arith.constant 32 : i32
      %c0_i32_41 = arith.constant 0 : i32
      %58 = arith.cmpi eq, %c32_i32, %c0_i32_41 : i32
      %c1_i32 = arith.constant 1 : i32
      %59 = arith.select %58, %c1_i32, %c32_i32 : i32
      %60 = vector.broadcast %59 : i32 to vector<1x128xi32>
      %61 = arith.remsi %57, %60 : vector<1x128xi32>
      %c0_i32_42 = arith.constant 0 : i32
      %62 = vector.broadcast %c0_i32_42 : i32 to vector<1x128xi32>
      %63 = arith.cmpi ne, %61, %62 : vector<1x128xi32>
      %c0_i32_43 = arith.constant 0 : i32
      %64 = vector.broadcast %c0_i32_43 : i32 to vector<1x128xi32>
      %65 = arith.cmpi slt, %61, %64 : vector<1x128xi32>
      %c0_i32_44 = arith.constant 0 : i32
      %66 = arith.cmpi slt, %59, %c0_i32_44 : i32
      %67 = vector.broadcast %66 : i1 to vector<1x128xi1>
      %68 = vector.broadcast %67 : vector<1x128xi1> to vector<1x128xi1>
      %69 = arith.xori %65, %68 : vector<1x128xi1>
      %70 = arith.andi %69, %63 : vector<1x128xi1>
      %71 = vector.broadcast %59 : i32 to vector<1x128xi32>
      %72 = arith.addi %61, %71 : vector<1x128xi32>
      %73 = arith.select %70, %72, %61 : vector<1x128xi1>, vector<1x128xi32>
      %c16_i32 = arith.constant 16 : i32
      %74 = vector.broadcast %c16_i32 : i32 to vector<1x128xi32>
      %75 = arith.cmpi slt, %73, %74 : vector<1x128xi32>
      %76 = arith.select %75, %56, %53 : vector<1x128xi1>, vector<1x128xf32>
      %77 = arith.truncf %76 : vector<1x128xf32> to vector<1x128xbf16>
      %c0_45 = arith.constant 0 : index
      %c0_46 = arith.constant 0 : index
      %78 = vector.load %arg9[%c0_45, %c0_46] : memref<128x128xbf16, #tpu.memory_space<vmem>>, vector<128x128xbf16>
      %cst_47 = arith.constant dense<0.000000e+00> : vector<1x128xf32>
      %79 = tpu.matmul %77, %78, %cst_47 {dimension_numbers = #tpu.dot_dimension_numbers<[1], [0], [0], [1], [0, 0, 1, 1], [], []>} : vector<1x128xbf16>, vector<128x128xbf16>, vector<1x128xf32> -> vector<1x128xf32>
      %c0_48 = arith.constant 0 : index
      %c0_49 = arith.constant 0 : index
      %80 = vector.load %arg10[%c0_48, %c0_49] : memref<1x128xf32, #tpu.memory_space<vmem>>, vector<1x128xf32>
      %81 = arith.addf %79, %80 : vector<1x128xf32>
      %c0_50 = arith.constant 0 : index
      %c0_51 = arith.constant 0 : index
      %c0_52 = arith.constant 0 : index
      %82 = vector.load %arg5[%c0_50, %c0_51, %c0_52] : memref<1x1x8xf32, #tpu.memory_space<vmem>>, vector<1x1x8xf32>
      %83 = vector.shape_cast %82 : vector<1x1x8xf32> to vector<1x8xf32>
      %84 = arith.truncf %83 : vector<1x8xf32> to vector<1x8xbf16>
      %c0_53 = arith.constant 0 : index
      %c0_54 = arith.constant 0 : index
      %85 = vector.load %arg11[%c0_53, %c0_54] : memref<8x32xbf16, #tpu.memory_space<vmem>>, vector<8x32xbf16>
      %cst_55 = arith.constant dense<0.000000e+00> : vector<1x32xf32>
      %86 = tpu.matmul %84, %85, %cst_55 {dimension_numbers = #tpu.dot_dimension_numbers<[1], [0], [0], [1], [0, 0, 1, 1], [], []>} : vector<1x8xbf16>, vector<8x32xbf16>, vector<1x32xf32> -> vector<1x32xf32>
      %c0_56 = arith.constant 0 : index
      %c0_57 = arith.constant 0 : index
      %87 = vector.load %arg12[%c0_56, %c0_57] : memref<1x32xf32, #tpu.memory_space<vmem>>, vector<1x32xf32>
      %88 = arith.addf %86, %87 : vector<1x32xf32>
      %cst_58 = arith.constant 0.000000e+00 : f32
      %89 = vector.broadcast %cst_58 : f32 to vector<1x32xf32>
      %90 = arith.maximumf %88, %89 : vector<1x32xf32>
      %91 = arith.truncf %90 : vector<1x32xf32> to vector<1x32xbf16>
      %c0_59 = arith.constant 0 : index
      %c0_60 = arith.constant 0 : index
      %92 = vector.load %arg13[%c0_59, %c0_60] : memref<32x32xbf16, #tpu.memory_space<vmem>>, vector<32x32xbf16>
      %cst_61 = arith.constant dense<0.000000e+00> : vector<1x32xf32>
      %93 = tpu.matmul %91, %92, %cst_61 {dimension_numbers = #tpu.dot_dimension_numbers<[1], [0], [0], [1], [0, 0, 1, 1], [], []>} : vector<1x32xbf16>, vector<32x32xbf16>, vector<1x32xf32> -> vector<1x32xf32>
      %c0_62 = arith.constant 0 : index
      %c0_63 = arith.constant 0 : index
      %94 = vector.load %arg14[%c0_62, %c0_63] : memref<1x32xf32, #tpu.memory_space<vmem>>, vector<1x32xf32>
      %95 = arith.addf %93, %94 : vector<1x32xf32>
      %96 = arith.truncf %95 : vector<1x32xf32> to vector<1x32xbf16>
      %c0_64 = arith.constant 0 : index
      %c0_65 = arith.constant 0 : index
      %97 = vector.load %arg15[%c0_64, %c0_65] : memref<32x64xbf16, #tpu.memory_space<vmem>>, vector<32x64xbf16>
      %cst_66 = arith.constant dense<0.000000e+00> : vector<1x64xf32>
      %98 = tpu.matmul %96, %97, %cst_66 {dimension_numbers = #tpu.dot_dimension_numbers<[1], [0], [0], [1], [0, 0, 1, 1], [], []>} : vector<1x32xbf16>, vector<32x64xbf16>, vector<1x64xf32> -> vector<1x64xf32>
      %99 = arith.truncf %81 : vector<1x128xf32> to vector<1x128xbf16>
      %c0_67 = arith.constant 0 : index
      %c0_68 = arith.constant 0 : index
      %100 = vector.load %arg16[%c0_67, %c0_68] : memref<128x64xbf16, #tpu.memory_space<vmem>>, vector<128x64xbf16>
      %cst_69 = arith.constant dense<0.000000e+00> : vector<1x64xf32>
      %101 = tpu.matmul %99, %100, %cst_69 {dimension_numbers = #tpu.dot_dimension_numbers<[1], [0], [0], [1], [0, 0, 1, 1], [], []>} : vector<1x128xbf16>, vector<128x64xbf16>, vector<1x64xf32> -> vector<1x64xf32>
      %102 = arith.addf %98, %101 : vector<1x64xf32>
      %c0_70 = arith.constant 0 : index
      %c0_71 = arith.constant 0 : index
      %103 = vector.load %arg17[%c0_70, %c0_71] : memref<1x64xf32, #tpu.memory_space<vmem>>, vector<1x64xf32>
      %104 = arith.addf %102, %103 : vector<1x64xf32>
      %cst_72 = arith.constant 0.000000e+00 : f32
      %105 = vector.broadcast %cst_72 : f32 to vector<1x64xf32>
      %106 = arith.maximumf %104, %105 : vector<1x64xf32>
      %107 = arith.truncf %106 : vector<1x64xf32> to vector<1x64xbf16>
      %c0_73 = arith.constant 0 : index
      %c0_74 = arith.constant 0 : index
      %108 = vector.load %arg18[%c0_73, %c0_74] : memref<64x40xbf16, #tpu.memory_space<vmem>>, vector<64x40xbf16>
      %cst_75 = arith.constant dense<0.000000e+00> : vector<1x40xf32>
      %109 = tpu.matmul %107, %108, %cst_75 {dimension_numbers = #tpu.dot_dimension_numbers<[1], [0], [0], [1], [0, 0, 1, 1], [], []>} : vector<1x64xbf16>, vector<64x40xbf16>, vector<1x40xf32> -> vector<1x40xf32>
      %c0_76 = arith.constant 0 : index
      %c0_77 = arith.constant 0 : index
      %110 = vector.load %arg19[%c0_76, %c0_77] : memref<1x40xf32, #tpu.memory_space<vmem>>, vector<1x40xf32>
      %111 = arith.addf %109, %110 : vector<1x40xf32>
      %c0_78 = arith.constant 0 : index
      %c0_79 = arith.constant 0 : index
      %c0_80 = arith.constant 0 : index
      %112 = vector.load %arg20[%c0_78, %c0_79, %c0_80] : memref<1x1x40xf32, #tpu.memory_space<vmem>>, vector<1x1x40xf32>
      %113 = vector.shape_cast %112 : vector<1x1x40xf32> to vector<1x40xf32>
      %114 = vector.shape_cast %111 : vector<1x40xf32> to vector<1x1x40xf32>
      tpu.vector_store %arg20[%c0_78, %c0_79, %c0_80], %114 {strides = array<i32>} : memref<1x1x40xf32, #tpu.memory_space<vmem>>, vector<1x1x40xf32>,
    } else {
    }
    return
  }
  func.func @transform_0(%arg0: i32, %arg1: i32) -> (i32, i32, i32) {
    %c0_i32 = arith.constant 0 : i32
    %c0_i32_0 = arith.constant 0 : i32
    return %arg0, %arg1, %c0_i32 : i32, i32, i32
  }
  func.func @transform_1(%arg0: i32, %arg1: i32) -> (i32, i32, i32) {
    %c0_i32 = arith.constant 0 : i32
    %c0_i32_0 = arith.constant 0 : i32
    %c0_i32_1 = arith.constant 0 : i32
    return %arg0, %c0_i32, %c0_i32_0 : i32, i32, i32
  }
  func.func @transform_2(%arg0: i32, %arg1: i32) -> (i32, i32, i32) {
    %c0_i32 = arith.constant 0 : i32
    %c0_i32_0 = arith.constant 0 : i32
    %c0_i32_1 = arith.constant 0 : i32
    return %arg0, %c0_i32, %c0_i32_0 : i32, i32, i32
  }
  func.func @transform_3(%arg0: i32, %arg1: i32) -> (i32, i32, i32) {
    %c0_i32 = arith.constant 0 : i32
    %c0_i32_0 = arith.constant 0 : i32
    %c0_i32_1 = arith.constant 0 : i32
    return %arg0, %c0_i32, %c0_i32_0 : i32, i32, i32
  }
  func.func @transform_4(%arg0: i32, %arg1: i32) -> (i32, i32) {
    %c0_i32 = arith.constant 0 : i32
    %c0_i32_0 = arith.constant 0 : i32
    %c0_i32_1 = arith.constant 0 : i32
    return %c0_i32, %c0_i32_0 : i32, i32
  }
  func.func @transform_5(%arg0: i32, %arg1: i32) -> (i32, i32) {
    %c0_i32 = arith.constant 0 : i32
    %c0_i32_0 = arith.constant 0 : i32
    %c0_i32_1 = arith.constant 0 : i32
    return %c0_i32, %c0_i32_0 : i32, i32
  }
  func.func @transform_6(%arg0: i32, %arg1: i32) -> (i32, i32) {
    %c0_i32 = arith.constant 0 : i32
    %c0_i32_0 = arith.constant 0 : i32
    %c0_i32_1 = arith.constant 0 : i32
    return %c0_i32, %c0_i32_0 : i32, i32
  }
  func.func @transform_7(%arg0: i32, %arg1: i32) -> (i32, i32) {
    %c0_i32 = arith.constant 0 : i32
    %c0_i32_0 = arith.constant 0 : i32
    %c0_i32_1 = arith.constant 0 : i32
    return %c0_i32, %c0_i32_0 : i32, i32
  }
  func.func @transform_8(%arg0: i32, %arg1: i32) -> (i32, i32) {
    %c0_i32 = arith.constant 0 : i32
    %c0_i32_0 = arith.constant 0 : i32
    %c0_i32_1 = arith.constant 0 : i32
    return %c0_i32, %c0_i32_0 : i32, i32
  }
  func.func @transform_9(%arg0: i32, %arg1: i32) -> (i32, i32) {
    %c0_i32 = arith.constant 0 : i32
    %c0_i32_0 = arith.constant 0 : i32
    %c0_i32_1 = arith.constant 0 : i32
    return %c0_i32, %c0_i32_0 : i32, i32
  }
  func.func @transform_10(%arg0: i32, %arg1: i32) -> (i32, i32) {
    %c0_i32 = arith.constant 0 : i32
    %c0_i32_0 = arith.constant 0 : i32
    %c0_i32_1 = arith.constant 0 : i32
    return %c0_i32, %c0_i32_0 : i32, i32
  }
  func.func @transform_11(%arg0: i32, %arg1: i32) -> (i32, i32) {
    %c0_i32 = arith.constant 0 : i32
    %c0_i32_0 = arith.constant 0 : i32
    %c0_i32_1 = arith.constant 0 : i32
    return %c0_i32, %c0_i32_0 : i32, i32
  }
  func.func @transform_12(%arg0: i32, %arg1: i32) -> (i32, i32) {
    %c0_i32 = arith.constant 0 : i32
    %c0_i32_0 = arith.constant 0 : i32
    %c0_i32_1 = arith.constant 0 : i32
    return %c0_i32, %c0_i32_0 : i32, i32
  }
  func.func @transform_13(%arg0: i32, %arg1: i32) -> (i32, i32) {
    %c0_i32 = arith.constant 0 : i32
    %c0_i32_0 = arith.constant 0 : i32
    %c0_i32_1 = arith.constant 0 : i32
    return %c0_i32, %c0_i32_0 : i32, i32
  }
  func.func @transform_14(%arg0: i32, %arg1: i32) -> (i32, i32) {
    %c0_i32 = arith.constant 0 : i32
    %c0_i32_0 = arith.constant 0 : i32
    %c0_i32_1 = arith.constant 0 : i32
    return %c0_i32, %c0_i32_0 : i32, i32
  }
  func.func @transform_15(%arg0: i32, %arg1: i32) -> (i32, i32) {
    %c0_i32 = arith.constant 0 : i32
    %c0_i32_0 = arith.constant 0 : i32
    %c0_i32_1 = arith.constant 0 : i32
    return %c0_i32, %c0_i32_0 : i32, i32
  }
  func.func @transform_16(%arg0: i32, %arg1: i32) -> (i32, i32) {
    %c0_i32 = arith.constant 0 : i32
    %c0_i32_0 = arith.constant 0 : i32
    %c0_i32_1 = arith.constant 0 : i32
    return %c0_i32, %c0_i32_0 : i32, i32
  }
  func.func @transform_17(%arg0: i32, %arg1: i32) -> (i32, i32) {
    %c0_i32 = arith.constant 0 : i32
    %c0_i32_0 = arith.constant 0 : i32
    %c0_i32_1 = arith.constant 0 : i32
    return %c0_i32, %c0_i32_0 : i32, i32
  }
  func.func @transform_18(%arg0: i32, %arg1: i32) -> (i32, i32, i32) {
    %c0_i32 = arith.constant 0 : i32
    %c0_i32_0 = arith.constant 0 : i32
    %c0_i32_1 = arith.constant 0 : i32
    return %arg0, %c0_i32, %c0_i32_0 : i32, i32, i32
  }
}

</mosaic_0001>

<bundles_post_ra>
// kernel: tpu_custom_call.1
= control target key start
LH: loop header
LB: loop body
LE: loop exit
PB: predicated region body
PF: predicated region fallthrough
CT: control target
= control target key end

     0   :  { %s4218_s0 = inlined_call_operand.vmem [shape: f32[2,512,16], index: 0, kind: input, shape index: {}]   ;;  %s4219_s1 = inlined_call_operand.vmem [shape: f32[2,1,128], index: 1, kind: input, shape index: {}]   ;;  %s4220_s2 = inlined_call_operand.vmem [shape: f32[2,1,128], index: 2, kind: input, shape index: {}]   ;;  %s4221_s3 = inlined_call_operand.vmem [shape: f32[2,1,8], index: 3, kind: input, shape index: {}]   ;;  %s4222_s4 = inlined_call_operand.vmem [shape: bf16[16,256], index: 4, kind: input, shape index: {}]   ;;  %s4223_s5 = inlined_call_operand.vmem [shape: bf16[128,128], index: 5, kind: input, shape index: {}]   ;;  %s4224_s6 = inlined_call_operand.vmem [shape: f32[1,128], index: 6, kind: input, shape index: {}]   ;;  %s4225_s7 = inlined_call_operand.vmem [shape: bf16[128,128], index: 7, kind: input, shape index: {}]   ;;  %s4226_s8 = inlined_call_operand.vmem [shape: f32[1,128], index: 8, kind: input, shape index: {}]   ;;  %s4227_s9 = inlined_call_operand.vmem [shape: bf16[8,32], index: 9, kind: input, shape index: {}]   ;;  %s4228_s10 = inlined_call_operand.vmem [shape: f32[1,32], index: 10, kind: input, shape index: {}]   ;;  %s4229_s11 = inlined_call_operand.vmem [shape: bf16[32,32], index: 11, kind: input, shape index: {}]   ;;  %s4230_s12 = inlined_call_operand.vmem [shape: f32[1,32], index: 12, kind: input, shape index: {}]   ;;  %s4231_s13 = inlined_call_operand.vmem [shape: bf16[32,64], index: 13, kind: input, shape index: {}]   ;;  %s4232_s14 = inlined_call_operand.vmem [shape: bf16[128,64], index: 14, kind: input, shape index: {}]   ;;  %s4233_s15 = inlined_call_operand.vmem [shape: f32[1,64], index: 15, kind: input, shape index: {}]   ;;  %s4234_s16 = inlined_call_operand.vmem [shape: bf16[64,40], index: 16, kind: input, shape index: {}]   ;;  %s4235_s17 = inlined_call_operand.vmem [shape: f32[1,40], index: 17, kind: input, shape index: {}]   ;;  %s4236_s18 = inlined_call_operand.hbm [shape: f32[2,1,40], index: 18, kind: output, shape index: {}]  }
   0x1   :  { %4259 = sst [smem:[#allocation30_spill]] %s4218_s0 }
   0x2   :  { %4260 = sst [smem:[#allocation31_spill]] %s4219_s1 }
   0x3   :  { %4261 = sst [smem:[#allocation32_spill]] %s4220_s2 }
   0x4   :  { %4262 = sst [smem:[#allocation33_spill]] %s4221_s3 }
   0x5   :  { %4263 = sst [smem:[#allocation34_spill]] %s4222_s4 }
   0x6   :  { %23 = vsyncpa [#allocation5], 0 }
   0x7   :  { %25 = vsyncpa [#allocation5 + $0x1], 0  ;;  %s3327_s27 = smov 0   ;;  %s3329_s28 = smov 0  }
   0x8   :  { %s3331_s29 = smov 0   ;;  %s3333_s30 = smov 0  }
   0x9   :  { %s3335_s0 = smov 0   ;;  %s3337_s19 = smov 0  }
   0xa LB: > { %4264 = sst [smem:[#allocation7_spill]] %s3221_s0  ;;  %s2742_s1 = sadd.s32 4294967295, %s3225_s19   ;;  %s3225_s19 = sphi %s3337_s19, %s31_s19   ;;  %s3221_s0 = sphi %s3335_s0, %s4316_s0   ;;  %s3217_s30 = sphi %s3333_s30, %s4315_s30   ;;  %s3213_s29 = sphi %s3331_s29, %s4319_s29   ;;  %s3209_s28 = sphi %s3329_s28, %s4318_s28   ;;  %s3205_s27 = sphi %s3327_s27, %s4317_s27  }
   0xb   : > { %s2743_s20 = sadd.s32 4294967294, %s3225_s19   ;;  %s43_s21 = sadd.s32 1, %s3221_s0 }
   0xc   : > { %s450_s22 = sadd.s32 1, %s3213_s29  ;;  %p45_p0 = scmp.ge.s32.totalorder %s43_s21, 2 }
   0xd   : > { %p460_p1 = scmp.ne.s32.totalorder %s3213_s29, %s3209_s28  ;;  %p461_p2 = scmp.eq.s32.totalorder %s2742_s1, 1 }
   0xe   : > { %p466_p3 = scmp.ne.s32.totalorder %s3209_s28, %s3205_s27  ;;  %s4321_s21 = smov (%p45_p0, %s43_s21), 0 }
   0xf   : > { %4265 = sst [smem:[#allocation8_spill]] %s4321_s21  ;;  %p3367_p4 = por %p461_p2, %p460_p1 }
  0x10   : > { %p467_p5 = scmp.eq.s32.totalorder %s2743_s20, 1  ;;  %s447_s23 = ssub.s32 %s3221_s0, %s4321_s21 }
  0x11   : > { %p2746_p6 = scmp.ge.s32.totalorder %s3225_s19, 1  ;;  %p448_p7 = scmp.eq.s32.totalorder %s447_s23, 0 }
  0x12   : > { %p3374_p8 = por %p467_p5, %p466_p3  ;;  %p558_p9 = scmp.lt.s32.totalorder %s3225_s19, 3 }
  0x13   : > { %s3380_s25 = scalar_select %p448_p7, %s3213_s29, %s450_s22  }
  0x14   : > { %p559_p10 = pnand %p2746_p6, %p558_p9 }
  0x15   : > { %4268 = sst [smem:[#allocation9_spill]] %s3380_s25 }
  0x16   : > { %562 = sbr.rel (%p559_p10) target bundleno = 1652 (0x674), region = 92 }
  0x1d   : > { %s4269_s4 = sld [smem:[#allocation34_spill]]  ;;  %p625_p11 = scmp.lt.s32.totalorder %s3217_s30, 1  ;;  %v3227_v2 = vmov 0   ;;  %vm752_vm0 = vcmask 130048   ;;  %v3112_v30 = vld [vmem:[%s4223_s5] sm:$0xff]   ;;  %v3113_v34 = vld [vmem:[%s4223_s5 + $0x8] sm:$0xff]  }
  0x1e   : > { %881 = vmatprep.mubr.bf16.mxu0 %v3227_v2  ;;  %s4270_s26 = sld [smem:[#allocation30_spill]]  ;;  %2896 = vmatprep.subr.bf16.mxu1 %v3112_v30  ;;  %v3114_v35 = vld [vmem:[%s4223_s5 + $0x10] sm:$0xff]   ;;  %v3115_v39 = vld [vmem:[%s4223_s5 + $0x18] sm:$0xff]   ;;  %v3116_v42 = vld [vmem:[%s4223_s5 + $0x20] sm:$0xff]   ;;  %s4271_s0 = sld [smem:[#allocation31_spill]] }
  0x1f   : > { %s3391_s23 = scalar_select %p625_p11, %s3217_s30, 1  ;;  %2897 = vmatpush3.bf16.msra.mxu1 %v3112_v30  ;;  %v3117_v44 = vld [vmem:[%s4223_s5 + $0x28] sm:$0xff]   ;;  %v3118_v47 = vld [vmem:[%s4223_s5 + $0x30] sm:$0xff]   ;;  %v3119_v49 = vld [vmem:[%s4223_s5 + $0x38] sm:$0xff]  }
  0x20   : > { %2898 = vmatprep.subr.bf16.mxu1 %v3113_v34  ;;  %s4312_s25 = sld [smem:[#allocation32_spill]]  ;;  %s4313_s3 = sld [smem:[#allocation33_spill]] }
  0x21   : > { %s2824_s22 = sshll.u32 %s3391_s23, 9 }
  0x23   : > { %v3109_v0 = vld [vmem:[%s4269_s4 + $0x4] ss:$8 sps:$4 sm:$0xff]   ;;  %v3111_v1 = vld [vmem:[%s4269_s4] ss:$8 sps:$4 sm:$0xff]   ;;  %2899 = vmatpush3.bf16.msra.mxu1 %v3113_v34 }
  0x24   : > { %849 = vmatprep.subr.bf16.mxu0 %v3109_v0  ;;  %s3397_s1 = scalar_lea.vmem %s4270_s26, %s2824_s22  ;;  %2900 = vmatprep.subr.bf16.mxu1 %v3114_v35  ;;  %s636_s21 = scalar_lea.vmem %s4271_s0, %s3391_s23 }
  0x25   : > { %850 = vmatpush1.bf16.msra.mxu0 %v3111_v1  ;;  %v644_v3 = vld [vmem:[%s3397_s1] sm:$0xff]  ;;  %v645_v4 = vld [vmem:[%s3397_s1 + $0x8] sm:$0xff]  ;;  %v646_v6 = vld [vmem:[%s3397_s1 + $0x10] sm:$0xff]  ;;  %s2821_s22 = sshll.u32 %s3217_s30, 4 }
  0x26   : > { %v708_v5 = vpack.c.bf16 %v645_v4, %v644_v3  ;;  %v647_v7 = vld [vmem:[%s3397_s1 + $0x18] sm:$0xff]  ;;  %v648_v9 = vld [vmem:[%s3397_s1 + $0x20] sm:$0xff]  ;;  %v649_v10 = vld [vmem:[%s3397_s1 + $0x28] sm:$0xff]  ;;  %s639_s20 = scalar_lea.vmem %s4312_s25, %s3391_s23  ;;  %s622_s25 = sand.u32 1, %s3209_s28  }
  0x27   : > { %v709_v8 = vpack.c.bf16 %v647_v7, %v646_v6  ;;  %v710_v11 = vpack.c.bf16 %v649_v10, %v648_v9  ;;  %v650_v12 = vld [vmem:[%s3397_s1 + $0x30] sm:$0xff]  ;;  %v651_v13 = vld [vmem:[%s3397_s1 + $0x38] sm:$0xff]  ;;  %v652_v15 = vld [vmem:[%s3397_s1 + $0x40] sm:$0xff]  ;;  %2901 = vmatpush3.bf16.msra.mxu1 %v3114_v35  ;;  %s623_s26 = scalar_lea.vmem [#allocation4], %s622_s25  ;;  %s2634_s30 = scalar_lea.sflag [#allocation5], %s622_s25 }
  0x28   : > { %2751 = vmatmul.mubr.msk.bf16.vlgmr.msra.gmra.mrb[0].mxu0 %vm752_vm0, %v708_v5  ;;  %v711_v14 = vpack.c.bf16 %v651_v13, %v650_v12  ;;  %v653_v16 = vld [vmem:[%s3397_s1 + $0x48] sm:$0xff]  ;;  %v654_v18 = vld [vmem:[%s3397_s1 + $0x50] sm:$0xff]  ;;  %v655_v19 = vld [vmem:[%s3397_s1 + $0x58] sm:$0xff]  ;;  %2902 = vmatprep.subr.bf16.mxu1 %v3115_v39  ;;  %s2646_s0 = sshll.u32 %s623_s26, 4  ;;  %s4173_s0 = int_to_ptr.vmem [resolvable:$true] %s2646_s0 }
  0x29   : > { %891 = vmatprep.mubr.bf16.mxu0 %v3227_v2  ;;  %v712_v17 = vpack.c.bf16 %v653_v16, %v652_v15  ;;  %v713_v20 = vpack.c.bf16 %v655_v19, %v654_v18  ;;  %v656_v21 = vld [vmem:[%s3397_s1 + $0x60] sm:$0xff]  ;;  %v657_v22 = vld [vmem:[%s3397_s1 + $0x68] sm:$0xff]  ;;  %v658_v24 = vld [vmem:[%s3397_s1 + $0x70] sm:$0xff] }
  0x2a   : > { %v714_v23 = vpack.c.bf16 %v657_v22, %v656_v21  ;;  %v659_v25 = vld [vmem:[%s3397_s1 + $0x78] sm:$0xff]  ;;  %v660_v27 = vld [vmem:[%s3397_s1 + $0x80] sm:$0xff]  ;;  %v661_v28 = vld [vmem:[%s3397_s1 + $0x88] sm:$0xff] }
  0x2b   : > { %v715_v26 = vpack.c.bf16 %v659_v25, %v658_v24  ;;  %v716_v29 = vpack.c.bf16 %v661_v28, %v660_v27  ;;  %v662_v31 = vld [vmem:[%s3397_s1 + $0x90] sm:$0xff]  ;;  %v663_v32 = vld [vmem:[%s3397_s1 + $0x98] sm:$0xff]  ;;  %v664_v36 = vld [vmem:[%s3397_s1 + $0xa0] sm:$0xff]  ;;  %2903 = vmatpush3.bf16.msra.mxu1 %v3115_v39 }
  0x2c   : > { %v717_v33 = vpack.c.bf16 %v663_v32, %v662_v31  ;;  %v665_v37 = vld [vmem:[%s3397_s1 + $0xa8] sm:$0xff]  ;;  %v666_v40 = vld [vmem:[%s3397_s1 + $0xb0] sm:$0xff]  ;;  %v667_v41 = vld [vmem:[%s3397_s1 + $0xb8] sm:$0xff]  ;;  %2904 = vmatprep.subr.bf16.mxu1 %v3116_v42 }
  0x2d   : > { %v718_v38 = vpack.c.bf16 %v665_v37, %v664_v36  ;;  %v719_v43 = vpack.c.bf16 %v667_v41, %v666_v40  ;;  %v668_v45 = vld [vmem:[%s3397_s1 + $0xc0] sm:$0xff]  ;;  %v669_v46 = vld [vmem:[%s3397_s1 + $0xc8] sm:$0xff]  ;;  %v670_v50 = vld [vmem:[%s3397_s1 + $0xd0] sm:$0xff] }
  0x2e   : > { %v720_v48 = vpack.c.bf16 %v669_v46, %v668_v45  ;;  %v671_v51 = vld [vmem:[%s3397_s1 + $0xd8] sm:$0xff]  ;;  %v672_v53 = vld [vmem:[%s3397_s1 + $0xe0] sm:$0xff]  ;;  %v673_v54 = vld [vmem:[%s3397_s1 + $0xe8] sm:$0xff] }
  0x2f   : > { %2905 = vmatpush3.bf16.msra.mxu1 %v3116_v42  ;;  %v721_v52 = vpack.c.bf16 %v671_v51, %v670_v50  ;;  %v722_v55 = vpack.c.bf16 %v673_v54, %v672_v53  ;;  %v674_v56 = vld [vmem:[%s3397_s1 + $0xf0] sm:$0xff]  ;;  %v675_v57 = vld [vmem:[%s3397_s1 + $0xf8] sm:$0xff]  ;;  %v676_v59 = vld [vmem:[%s3397_s1 + $0x100] sm:$0xff] }
  0x30   : > { %2752 = vmatmul.mubr.msk.bf16.gmra.mrb[4].mxu0 %vm752_vm0, %v709_v8  ;;  %2906 = vmatprep.subr.bf16.mxu1 %v3117_v44  ;;  %v723_v58 = vpack.c.bf16 %v675_v57, %v674_v56  ;;  %v677_v60 = vld [vmem:[%s3397_s1 + $0x108] sm:$0xff]  ;;  %v678_v62 = vld [vmem:[%s3397_s1 + $0x110] sm:$0xff]  ;;  %v679_v63 = vld [vmem:[%s3397_s1 + $0x118] sm:$0xff] }
  0x31   : > { %901 = vmatprep.mubr.bf16.mxu0 %v3227_v2  ;;  %v724_v61 = vpack.c.bf16 %v677_v60, %v676_v59  ;;  %v725_v0 = vpack.c.bf16 %v679_v63, %v678_v62  ;;  %v680_v1 = vld [vmem:[%s3397_s1 + $0x120] sm:$0xff]  ;;  %v681_v3 = vld [vmem:[%s3397_s1 + $0x128] sm:$0xff]  ;;  %v682_v5 = vld [vmem:[%s3397_s1 + $0x130] sm:$0xff] }
  0x32   : > { %v726_v4 = vpack.c.bf16 %v681_v3, %v680_v1  ;;  %v683_v6 = vld [vmem:[%s3397_s1 + $0x138] sm:$0xff]  ;;  %v684_v8 = vld [vmem:[%s3397_s1 + $0x140] sm:$0xff]  ;;  %v685_v9 = vld [vmem:[%s3397_s1 + $0x148] sm:$0xff] }
  0x33   : > { %2907 = vmatpush3.bf16.msra.mxu1 %v3117_v44  ;;  %v727_v7 = vpack.c.bf16 %v683_v6, %v682_v5  ;;  %v728_v10 = vpack.c.bf16 %v685_v9, %v684_v8  ;;  %v687_v12 = vld [vmem:[%s3397_s1 + $0x158] sm:$0xff]  ;;  %v689_v15 = vld [vmem:[%s3397_s1 + $0x168] sm:$0xff]  ;;  %v698_v30 = vld [vmem:[%s3397_s1 + $0x1b0] sm:$0xff] }
  0x34   : > { %2908 = vmatprep.subr.bf16.mxu1 %v3118_v47  ;;  %v691_v18 = vld [vmem:[%s3397_s1 + $0x178] sm:$0xff]  ;;  %v693_v21 = vld [vmem:[%s3397_s1 + $0x188] sm:$0xff]  ;;  %v700_v41 = vld [vmem:[%s3397_s1 + $0x1c0] sm:$0xff] }
  0x35   : > { %v695_v24 = vld [vmem:[%s3397_s1 + $0x198] sm:$0xff]  ;;  %v697_v27 = vld [vmem:[%s3397_s1 + $0x1a8] sm:$0xff]  ;;  %v702_v53 = vld [vmem:[%s3397_s1 + $0x1d0] sm:$0xff] }
  0x36   : > { %v699_v31 = vld [vmem:[%s3397_s1 + $0x1b8] sm:$0xff]  ;;  %v701_v42 = vld [vmem:[%s3397_s1 + $0x1c8] sm:$0xff]  ;;  %v704_v1 = vld [vmem:[%s3397_s1 + $0x1e0] sm:$0xff] }
  0x37   : > { %2909 = vmatpush3.bf16.msra.mxu1 %v3118_v47  ;;  %v735_v35 = vpack.c.bf16 %v699_v31, %v698_v30  ;;  %v736_v47 = vpack.c.bf16 %v701_v42, %v700_v41  ;;  %v703_v54 = vld [vmem:[%s3397_s1 + $0x1d8] sm:$0xff]  ;;  %v705_v3 = vld [vmem:[%s3397_s1 + $0x1e8] sm:$0xff] }
  0x38   : > { %2753 = vmatmul.mubr.msk.bf16.gmra.mrb[8].mxu0 %vm752_vm0, %v710_v11  ;;  %2910 = vmatprep.subr.bf16.mxu1 %v3119_v49  ;;  %v686_v11 = vld [vmem:[%s3397_s1 + $0x150] sm:$0xff]  ;;  %v737_v59 = vpack.c.bf16 %v703_v54, %v702_v53  ;;  %v738_v8 = vpack.c.bf16 %v705_v3, %v704_v1 }
  0x39   : > { %911 = vmatprep.mubr.bf16.mxu0 %v3227_v2  ;;  %v729_v13 = vpack.c.bf16 %v687_v12, %v686_v11 }
  0x3b   : > { %2911 = vmatpush3.bf16.msra.mxu1 %v3119_v49 }
  0x40   : > { %2754 = vmatmul.mubr.msk.bf16.gmra.mrb[12].mxu0 %vm752_vm0, %v711_v14  ;;  %v688_v14 = vld [vmem:[%s3397_s1 + $0x160] sm:$0xff] }
  0x41   : > { %921 = vmatprep.mubr.bf16.mxu0 %v3227_v2  ;;  %v730_v16 = vpack.c.bf16 %v689_v15, %v688_v14  ;;  %v706_v14 = vld [vmem:[%s3397_s1 + $0x1f0] sm:$0xff]  ;;  %v707_v15 = vld [vmem:[%s3397_s1 + $0x1f8] sm:$0xff] }
  0x48   : > { %2755 = vmatmul.mubr.msk.bf16.gmra.mrb[16].mxu0 %vm752_vm0, %v712_v17  ;;  %v690_v17 = vld [vmem:[%s3397_s1 + $0x170] sm:$0xff] }
  0x49   : > { %931 = vmatprep.mubr.bf16.mxu0 %v3227_v2  ;;  %v731_v19 = vpack.c.bf16 %v691_v18, %v690_v17 }
  0x50   : > { %2756 = vmatmul.mubr.msk.bf16.gmra.mrb[20].mxu0 %vm752_vm0, %v713_v20  ;;  %v692_v20 = vld [vmem:[%s3397_s1 + $0x180] sm:$0xff] }
  0x51   : > { %941 = vmatprep.mubr.bf16.mxu0 %v3227_v2  ;;  %v732_v22 = vpack.c.bf16 %v693_v21, %v692_v20  ;;  %v739_v20 = vpack.c.bf16 %v707_v15, %v706_v14 }
  0x58   : > { %2757 = vmatmul.mubr.msk.bf16.gmra.mrb[24].mxu0 %vm752_vm0, %v714_v23  ;;  %v694_v23 = vld [vmem:[%s3397_s1 + $0x190] sm:$0xff] }
  0x59   : > { %951 = vmatprep.mubr.bf16.mxu0 %v3227_v2  ;;  %v733_v25 = vpack.c.bf16 %v695_v24, %v694_v23 }
  0x60   : > { %2758 = vmatmul.mubr.msk.bf16.gmra.mrb[28].mxu0 %vm752_vm0, %v715_v26  ;;  %v696_v26 = vld [vmem:[%s3397_s1 + $0x1a0] sm:$0xff]  ;;  %s642_s1 = scalar_lea.vmem %s4313_s3, %s3391_s23  ;;  %s4171_s3 = scalar_lea.hbm %s4236_s18, %s2821_s22 }
  0x61   : > { %961 = vmatprep.mubr.bf16.mxu0 %v3227_v2  ;;  %v734_v28 = vpack.c.bf16 %v697_v27, %v696_v26  ;;  %s3231_s23 = smov [#allocation4]  }
  0x62   : > { %s3151_s4 = sshll.u32 %s3231_s23, 4  ;;  %s3152_s4 = int_to_ptr.vmem [resolvable:$false] %s3151_s4 }
  0x63   : > { %p3154_p1 = scmp.lt.s32.totalorder %s4173_s0, %s3152_s4 }
  0x68   : > { %2759 = vmatmul.mubr.msk.bf16.gmra.mrb[32].mxu0 %vm752_vm0, %v716_v29  ;;  %v3534_v29 = vld [vmem:[%s636_s21] ss:$0 sm:$0xff]  ;;  %s3153_s21 = scalar_lea.vmem %s3152_s4, 32 }
  0x69   : > { %971 = vmatprep.mubr.bf16.mxu0 %v3227_v2 }
  0x70   : > { %2760 = vmatmul.mubr.msk.bf16.gmra.mrb[36].mxu0 %vm752_vm0, %v717_v33 }
  0x71   : > { %981 = vmatprep.mubr.bf16.mxu0 %v3227_v2 }
  0x78   : > { %2761 = vmatmul.mubr.msk.bf16.gmra.mrb[40].mxu0 %vm752_vm0, %v718_v38 }
  0x79   : > { %991 = vmatprep.mubr.bf16.mxu0 %v3227_v2 }
  0x80   : > { %2762 = vmatmul.mubr.msk.bf16.gmra.mrb[44].mxu0 %vm752_vm0, %v719_v43 }
  0x81   : > { %1001 = vmatprep.mubr.bf16.mxu0 %v3227_v2 }
  0x88   : > { %2763 = vmatmul.mubr.msk.bf16.gmra.mrb[48].mxu0 %vm752_vm0, %v720_v48 }
  0x89   : > { %1011 = vmatprep.mubr.bf16.mxu0 %v3227_v2 }
  0x90   : > { %2764 = vmatmul.mubr.msk.bf16.gmra.mrb[52].mxu0 %vm752_vm0, %v721_v52 }
  0x91   : > { %1021 = vmatprep.mubr.bf16.mxu0 %v3227_v2 }
  0x98   : > { %2765 = vmatmul.mubr.msk.bf16.gmra.mrb[56].mxu0 %vm752_vm0, %v722_v55 }
  0x99   : > { %1031 = vmatprep.mubr.bf16.mxu0 %v3227_v2 }
  0xa0   : > { %2766 = vmatmul.mubr.msk.bf16.gmra.mrb[60].mxu0 %vm752_vm0, %v723_v58 }
  0xa1   : > { %1041 = vmatprep.mubr.bf16.mxu0 %v3227_v2 }
  0xa8   : > { %2767 = vmatmul.mubr.msk.bf16.gmra.mrb[64].mxu0 %vm752_vm0, %v724_v61 }
  0xa9   : > { %1051 = vmatprep.mubr.bf16.mxu0 %v3227_v2 }
  0xb0   : > { %2768 = vmatmul.mubr.msk.bf16.gmra.mrb[68].mxu0 %vm752_vm0, %v725_v0 }
  0xb1   : > { %1061 = vmatprep.mubr.bf16.mxu0 %v3227_v2 }
  0xb8   : > { %2769 = vmatmul.mubr.msk.bf16.gmra.mrb[72].mxu0 %vm752_vm0, %v726_v4 }
  0xb9   : > { %1071 = vmatprep.mubr.bf16.mxu0 %v3227_v2 }
  0xc0   : > { %2770 = vmatmul.mubr.msk.bf16.gmra.mrb[76].mxu0 %vm752_vm0, %v727_v7 }
  0xc1   : > { %1081 = vmatprep.mubr.bf16.mxu0 %v3227_v2 }
  0xc8   : > { %2771 = vmatmul.mubr.msk.bf16.gmra.mrb[80].mxu0 %vm752_vm0, %v728_v10 }
  0xc9   : > { %1091 = vmatprep.mubr.bf16.mxu0 %v3227_v2 }
  0xd0   : > { %2772 = vmatmul.mubr.msk.bf16.gmra.mrb[84].mxu0 %vm752_vm0, %v729_v13 }
  0xd1   : > { %1101 = vmatprep.mubr.bf16.mxu0 %v3227_v2 }
  0xd8   : > { %2773 = vmatmul.mubr.msk.bf16.gmra.mrb[88].mxu0 %vm752_vm0, %v730_v16 }
  0xd9   : > { %1111 = vmatprep.mubr.bf16.mxu0 %v3227_v2 }
  0xe0   : > { %2774 = vmatmul.mubr.msk.bf16.gmra.mrb[92].mxu0 %vm752_vm0, %v731_v19 }
  0xe1   : > { %1121 = vmatprep.mubr.bf16.mxu0 %v3227_v2 }
  0xe8   : > { %2775 = vmatmul.mubr.msk.bf16.gmra.mrb[96].mxu0 %vm752_vm0, %v732_v22 }
  0xe9   : > { %1131 = vmatprep.mubr.bf16.mxu0 %v3227_v2 }
  0xf0   : > { %2776 = vmatmul.mubr.msk.bf16.gmra.mrb[100].mxu0 %vm752_vm0, %v733_v25 }
  0xf1   : > { %1141 = vmatprep.mubr.bf16.mxu0 %v3227_v2 }
  0xf8   : > { %2777 = vmatmul.mubr.msk.bf16.gmra.mrb[104].mxu0 %vm752_vm0, %v734_v28 }
  0xf9   : > { %1151 = vmatprep.mubr.bf16.mxu0 %v3227_v2 }
  0xfb   : > { %v883_v32 = vpop.f32.mrb[0].mxu0 }
  0xfc   : > { %v1209_v33 = vadd.f32 %v3534_v29, %v883_v32  ;;  %v3540_v34 = vpop.f32.mrb[1].mxu0 }
  0xfd   : > { %v887_v36 = vpop.f32.mrb[2].mxu0  ;;  %vm1793_vm1 = vcmp.gt.f32.partialorder %v3540_v34, 0.5 }
  0xfe   : > { %v1210_v37 = vadd.f32 %v3534_v29, %v887_v36  ;;  %v3543_v38 = vpop.f32.mrb[3].mxu0  ;;  %v1273_v39 = vmax.f32 %v1209_v33, 0.0 }
  0xff   : > { %vm1794_vm4 = vcmp.gt.f32.partialorder %v3543_v38, 0.5 }
 0x100   : > { %v1274_v40 = vmax.f32 %v1210_v37, 0.0  ;;  %2778 = vmatmul.mubr.msk.bf16.gmra.mrb[108].mxu0 %vm752_vm0, %v735_v35 }
 0x101   : > { %1161 = vmatprep.mubr.bf16.mxu0 %v3227_v2 }
 0x102   : > { %v1337_v43 = vpack.c.bf16 %v1274_v40, %v1273_v39 }
 0x103   : > { %v893_v44 = vpop.f32.mrb[4].mxu0 }
 0x104   : > { %v1211_v45 = vadd.f32 %v3534_v29, %v893_v44  ;;  %v3550_v46 = vpop.f32.mrb[5].mxu0  ;;  %2912 = vmatprep.mubr.bf16.mxu1 %v1337_v43 }
 0x105   : > { %v897_v48 = vpop.f32.mrb[6].mxu0  ;;  %vm1795_vm2 = vcmp.gt.f32.partialorder %v3550_v46, 0.5 }
 0x106   : > { %v1212_v49 = vadd.f32 %v3534_v29, %v897_v48  ;;  %v3553_v50 = vpop.f32.mrb[7].mxu0  ;;  %v1275_v51 = vmax.f32 %v1211_v45, 0.0 }
 0x107   : > { %vm1796_vm3 = vcmp.gt.f32.partialorder %v3553_v50, 0.5 }
 0x108   : > { %v1276_v52 = vmax.f32 %v1212_v49, 0.0  ;;  %2779 = vmatmul.mubr.msk.bf16.gmra.mrb[112].mxu0 %vm752_vm0, %v736_v47 }
 0x109   : > { %1171 = vmatprep.mubr.bf16.mxu0 %v3227_v2 }
 0x10a   : > { %v1338_v55 = vpack.c.bf16 %v1276_v52, %v1275_v51 }
 0x10b   : > { %v903_v56 = vpop.f32.mrb[8].mxu0 }
 0x10c   : > { %v1213_v57 = vadd.f32 %v3534_v29, %v903_v56  ;;  %v3560_v58 = vpop.f32.mrb[9].mxu0  ;;  %2913 = vmatmul.mubr.bf16.vlgmr.msra.gmra.mrb[0].mxu1 %v1338_v55 }
 0x10d   : > { %v907_v60 = vpop.f32.mrb[10].mxu0  ;;  %vm1797_vm5 = vcmp.gt.f32.partialorder %v3560_v58, 0.5 }
 0x10e   : > { %v1214_v61 = vadd.f32 %v3534_v29, %v907_v60  ;;  %v3563_v62 = vpop.f32.mrb[11].mxu0  ;;  %v1277_v63 = vmax.f32 %v1213_v57, 0.0 }
 0x10f   : > { %vm1798_vm6 = vcmp.gt.f32.partialorder %v3563_v62, 0.5 }
 0x110   : > { %v1278_v0 = vmax.f32 %v1214_v61, 0.0  ;;  %2780 = vmatmul.mubr.msk.bf16.gmra.mrb[116].mxu0 %vm752_vm0, %v737_v59 }
 0x111   : > { %1181 = vmatprep.mubr.bf16.mxu0 %v3227_v2 }
 0x112   : > { %v1339_v4 = vpack.c.bf16 %v1278_v0, %v1277_v63 }
 0x113   : > { %v913_v5 = vpop.f32.mrb[12].mxu0 }
 0x114   : > { %v1215_v6 = vadd.f32 %v3534_v29, %v913_v5  ;;  %v3570_v7 = vpop.f32.mrb[13].mxu0  ;;  %2916 = vmatprep.mubr.bf16.mxu1 %v1339_v4 }
 0x115   : > { %v917_v9 = vpop.f32.mrb[14].mxu0  ;;  %vm1799_vm7 = vcmp.gt.f32.partialorder %v3570_v7, 0.5 }
 0x116   : > { %v1216_v10 = vadd.f32 %v3534_v29, %v917_v9  ;;  %v3573_v11 = vpop.f32.mrb[15].mxu0  ;;  %v1279_v12 = vmax.f32 %v1215_v6, 0.0 }
 0x117   : > { %vm1800_vm8 = vcmp.gt.f32.partialorder %v3573_v11, 0.5 }
 0x118   : > { %v1280_v13 = vmax.f32 %v1216_v10, 0.0  ;;  %2781 = vmatmul.mubr.msk.bf16.gmra.mrb[120].mxu0 %vm752_vm0, %v738_v8 }
 0x119   : > { %1191 = vmatprep.mubr.bf16.mxu0 %v3227_v2 }
 0x11a   : > { %v1340_v16 = vpack.c.bf16 %v1280_v13, %v1279_v12 }
 0x11b   : > { %v923_v17 = vpop.f32.mrb[16].mxu0 }
 0x11c   : > { %v1217_v18 = vadd.f32 %v3534_v29, %v923_v17  ;;  %v3580_v19 = vpop.f32.mrb[17].mxu0  ;;  %2917 = vmatmul.mubr.bf16.gmra.mrb[4].mxu1 %v1340_v16 }
 0x11d   : > { %v927_v21 = vpop.f32.mrb[18].mxu0  ;;  %vm1801_vm9 = vcmp.gt.f32.partialorder %v3580_v19, 0.5 }
 0x11e   : > { %v1218_v22 = vadd.f32 %v3534_v29, %v927_v21  ;;  %v3583_v23 = vpop.f32.mrb[19].mxu0  ;;  %v1281_v24 = vmax.f32 %v1217_v18, 0.0 }
 0x11f   : > { %vm1802_vm12 = vcmp.gt.f32.partialorder %v3583_v23, 0.5 }
 0x120   : > { %v1282_v25 = vmax.f32 %v1218_v22, 0.0  ;;  %2782 = vmatmul.mubr.msk.bf16.gmra.mrb[124].mxu0 %vm752_vm0, %v739_v20 }
 0x122   : > { %v1341_v2 = vpack.c.bf16 %v1282_v25, %v1281_v24 }
 0x123   : > { %v933_v26 = vpop.f32.mrb[20].mxu0 }
 0x124   : > { %v1219_v27 = vadd.f32 %v3534_v29, %v933_v26  ;;  %v3587_v28 = vpop.f32.mrb[21].mxu0  ;;  %2920 = vmatprep.mubr.bf16.mxu1 %v1341_v2 }
 0x125   : > { %v937_v30 = vpop.f32.mrb[22].mxu0  ;;  %vm1803_vm10 = vcmp.gt.f32.partialorder %v3587_v28, 0.5 }
 0x126   : > { %v1220_v31 = vadd.f32 %v3534_v29, %v937_v30  ;;  %v3590_v32 = vpop.f32.mrb[23].mxu0  ;;  %v1283_v33 = vmax.f32 %v1219_v27, 0.0 }
 0x127   : > { %vm1804_vm11 = vcmp.gt.f32.partialorder %v3590_v32, 0.5 }
 0x128   : > { %v1284_v35 = vmax.f32 %v1220_v31, 0.0 }
 0x12a   : > { %v1342_v36 = vpack.c.bf16 %v1284_v35, %v1283_v33 }
 0x12b   : > { %v943_v37 = vpop.f32.mrb[24].mxu0 }
 0x12c   : > { %v1221_v39 = vadd.f32 %v3534_v29, %v943_v37  ;;  %v3593_v40 = vpop.f32.mrb[25].mxu0  ;;  %2921 = vmatmul.mubr.bf16.gmra.mrb[8].mxu1 %v1342_v36 }
 0x12d   : > { %v947_v41 = vpop.f32.mrb[26].mxu0  ;;  %vm1805_vm13 = vcmp.gt.f32.partialorder %v3593_v40, 0.5 }
 0x12e   : > { %v1222_v42 = vadd.f32 %v3534_v29, %v947_v41  ;;  %v3596_v43 = vpop.f32.mrb[27].mxu0  ;;  %v1285_v44 = vmax.f32 %v1221_v39, 0.0 }
 0x12f   : > { %vm1806_vm0 = vcmp.gt.f32.partialorder %v3596_v43, 0.5 }
 0x130   : > { %v1286_v45 = vmax.f32 %v1222_v42, 0.0 }
 0x132   : > { %v1343_v47 = vpack.c.bf16 %v1286_v45, %v1285_v44 }
 0x133   : > { %v953_v48 = vpop.f32.mrb[28].mxu0 }
 0x134   : > { %v1223_v49 = vadd.f32 %v3534_v29, %v953_v48  ;;  %v3599_v51 = vpop.f32.mrb[29].mxu0  ;;  %2924 = vmatprep.mubr.bf16.mxu1 %v1343_v47 }
 0x135   : > { %v957_v52 = vpop.f32.mrb[30].mxu0  ;;  %vm1807_vm14 = vcmp.gt.f32.partialorder %v3599_v51, 0.5 }
 0x136   : > { %v1224_v53 = vadd.f32 %v3534_v29, %v957_v52  ;;  %v3602_v54 = vpop.f32.mrb[31].mxu0  ;;  %v1287_v55 = vmax.f32 %v1223_v49, 0.0 }
 0x137   : > { %vm1808_vm15 = vcmp.gt.f32.partialorder %v3602_v54, 0.5 }
 0x138   : > { %v1288_v56 = vmax.f32 %v1224_v53, 0.0 }
 0x13a   : > { %v1344_v57 = vpack.c.bf16 %v1288_v56, %v1287_v55 }
 0x13b   : > { %v963_v59 = vpop.f32.mrb[32].mxu0 }
 0x13c   : > { %v1225_v60 = vadd.f32 %v3534_v29, %v963_v59  ;;  %v3605_v61 = vpop.f32.mrb[33].mxu0  ;;  %2925 = vmatmul.mubr.bf16.gmra.mrb[12].mxu1 %v1344_v57 }
 0x13d   : > { %v967_v63 = vpop.f32.mrb[34].mxu0 }
 0x13e   : > { %v1226_v0 = vadd.f32 %v3534_v29, %v967_v63  ;;  %v3608_v1 = vpop.f32.mrb[35].mxu0  ;;  %v1289_v3 = vmax.f32 %v1225_v60, 0.0 }
 0x140   : > { %v1290_v4 = vmax.f32 %v1226_v0, 0.0 }
 0x142   : > { %v1345_v5 = vpack.c.bf16 %v1290_v4, %v1289_v3 }
 0x143   : > { %v973_v6 = vpop.f32.mrb[36].mxu0 }
 0x144   : > { %v1227_v8 = vadd.f32 %v3534_v29, %v973_v6  ;;  %v3611_v9 = vpop.f32.mrb[37].mxu0  ;;  %2928 = vmatprep.mubr.bf16.mxu1 %v1345_v5 }
 0x145   : > { %v977_v10 = vpop.f32.mrb[38].mxu0 }
 0x146   : > { %v1228_v12 = vadd.f32 %v3534_v29, %v977_v10  ;;  %v3614_v13 = vpop.f32.mrb[39].mxu0  ;;  %v1291_v14 = vmax.f32 %v1227_v8, 0.0 }
 0x148   : > { %v1292_v15 = vmax.f32 %v1228_v12, 0.0 }
 0x14a   : > { %v1346_v16 = vpack.c.bf16 %v1292_v15, %v1291_v14 }
 0x14b   : > { %v983_v17 = vpop.f32.mrb[40].mxu0 }
 0x14c   : > { %v1229_v18 = vadd.f32 %v3534_v29, %v983_v17  ;;  %v3617_v20 = vpop.f32.mrb[41].mxu0  ;;  %2929 = vmatmul.mubr.bf16.gmra.mrb[16].mxu1 %v1346_v16 }
 0x14d   : > { %v987_v21 = vpop.f32.mrb[42].mxu0 }
 0x14e   : > { %v1230_v22 = vadd.f32 %v3534_v29, %v987_v21  ;;  %v3620_v24 = vpop.f32.mrb[43].mxu0  ;;  %v1293_v25 = vmax.f32 %v1229_v18, 0.0 }
 0x150   : > { %v1294_v2 = vmax.f32 %v1230_v22, 0.0 }
 0x152   : > { %v1347_v26 = vpack.c.bf16 %v1294_v2, %v1293_v25 }
 0x153   : > { %v993_v27 = vpop.f32.mrb[44].mxu0 }
 0x154   : > { %v1231_v30 = vadd.f32 %v3534_v29, %v993_v27  ;;  %v3623_v31 = vpop.f32.mrb[45].mxu0  ;;  %2932 = vmatprep.mubr.bf16.mxu1 %v1347_v26 }
 0x155   : > { %v997_v33 = vpop.f32.mrb[46].mxu0 }
 0x156   : > { %v1232_v35 = vadd.f32 %v3534_v29, %v997_v33  ;;  %v3626_v36 = vpop.f32.mrb[47].mxu0  ;;  %v1295_v37 = vmax.f32 %v1231_v30, 0.0 }
 0x158   : > { %v1296_v39 = vmax.f32 %v1232_v35, 0.0 }
 0x15a   : > { %v1348_v41 = vpack.c.bf16 %v1296_v39, %v1295_v37 }
 0x15b   : > { %v1003_v42 = vpop.f32.mrb[48].mxu0 }
 0x15c   : > { %v1233_v44 = vadd.f32 %v3534_v29, %v1003_v42  ;;  %v3629_v45 = vpop.f32.mrb[49].mxu0  ;;  %2933 = vmatmul.mubr.bf16.gmra.mrb[20].mxu1 %v1348_v41 }
 0x15d   : > { %v1007_v47 = vpop.f32.mrb[50].mxu0 }
 0x15e   : > { %v1234_v48 = vadd.f32 %v3534_v29, %v1007_v47  ;;  %v3632_v49 = vpop.f32.mrb[51].mxu0  ;;  %v1297_v52 = vmax.f32 %v1233_v44, 0.0 }
 0x160   : > { %v1298_v53 = vmax.f32 %v1234_v48, 0.0 }
 0x162   : > { %v1349_v55 = vpack.c.bf16 %v1298_v53, %v1297_v52 }
 0x163   : > { %v1013_v56 = vpop.f32.mrb[52].mxu0 }
 0x164   : > { %v1235_v57 = vadd.f32 %v3534_v29, %v1013_v56  ;;  %v3635_v59 = vpop.f32.mrb[53].mxu0  ;;  %2936 = vmatprep.mubr.bf16.mxu1 %v1349_v55 }
 0x165   : > { %v1017_v60 = vpop.f32.mrb[54].mxu0 }
 0x166   : > { %v1236_v63 = vadd.f32 %v3534_v29, %v1017_v60  ;;  %v3638_v0 = vpop.f32.mrb[55].mxu0  ;;  %v1299_v3 = vmax.f32 %v1235_v57, 0.0 }
 0x168   : > { %v1300_v4 = vmax.f32 %v1236_v63, 0.0 }
 0x16a   : > { %v1350_v5 = vpack.c.bf16 %v1300_v4, %v1299_v3 }
 0x16b   : > { %v1023_v6 = vpop.f32.mrb[56].mxu0 }
 0x16c   : > { %v1237_v8 = vadd.f32 %v3534_v29, %v1023_v6  ;;  %v3641_v10 = vpop.f32.mrb[57].mxu0  ;;  %2937 = vmatmul.mubr.bf16.gmra.mrb[24].mxu1 %v1350_v5 }
 0x16d   : > { %v1027_v12 = vpop.f32.mrb[58].mxu0 }
 0x16e   : > { %v1238_v14 = vadd.f32 %v3534_v29, %v1027_v12  ;;  %v3644_v15 = vpop.f32.mrb[59].mxu0  ;;  %v1301_v16 = vmax.f32 %v1237_v8, 0.0 }
 0x170   : > { %v1302_v17 = vmax.f32 %v1238_v14, 0.0 }
 0x172   : > { %v1351_v18 = vpack.c.bf16 %v1302_v17, %v1301_v16 }
 0x173   : > { %v1033_v21 = vpop.f32.mrb[60].mxu0 }
 0x174   : > { %v1239_v22 = vadd.f32 %v3534_v29, %v1033_v21  ;;  %v3647_v25 = vpop.f32.mrb[61].mxu0  ;;  %2940 = vmatprep.mubr.bf16.mxu1 %v1351_v18 }
 0x175   : > { %v1037_v2 = vpop.f32.mrb[62].mxu0 }
 0x176   : > { %v1240_v26 = vadd.f32 %v3534_v29, %v1037_v2  ;;  %v3650_v27 = vpop.f32.mrb[63].mxu0  ;;  %v1303_v30 = vmax.f32 %v1239_v22, 0.0 }
 0x178   : > { %v1304_v33 = vmax.f32 %v1240_v26, 0.0 }
 0x17a   : > { %v1352_v35 = vpack.c.bf16 %v1304_v33, %v1303_v30 }
 0x17b   : > { %v1043_v37 = vpop.f32.mrb[64].mxu0 }
 0x17c   : > { %v1241_v39 = vadd.f32 %v3534_v29, %v1043_v37  ;;  %v3653_v41 = vpop.f32.mrb[65].mxu0  ;;  %2941 = vmatmul.mubr.bf16.gmra.mrb[28].mxu1 %v1352_v35 }
 0x17d   : > { %v1047_v42 = vpop.f32.mrb[66].mxu0 }
 0x17e   : > { %v1242_v44 = vadd.f32 %v3534_v29, %v1047_v42  ;;  %v3656_v47 = vpop.f32.mrb[67].mxu0  ;;  %v1305_v48 = vmax.f32 %v1241_v39, 0.0 }
 0x180   : > { %v1306_v52 = vmax.f32 %v1242_v44, 0.0 }
 0x182   : > { %v1353_v53 = vpack.c.bf16 %v1306_v52, %v1305_v48 }
 0x183   : > { %v1053_v55 = vpop.f32.mrb[68].mxu0 }
 0x184   : > { %v1243_v56 = vadd.f32 %v3534_v29, %v1053_v55  ;;  %v3659_v57 = vpop.f32.mrb[69].mxu0  ;;  %2944 = vmatprep.mubr.bf16.mxu1 %v1353_v53 }
 0x185   : > { %v1057_v60 = vpop.f32.mrb[70].mxu0 }
 0x186   : > { %v1244_v63 = vadd.f32 %v3534_v29, %v1057_v60  ;;  %v3662_v3 = vpop.f32.mrb[71].mxu0  ;;  %v1307_v4 = vmax.f32 %v1243_v56, 0.0 }
 0x188   : > { %v1308_v5 = vmax.f32 %v1244_v63, 0.0 }
 0x18a   : > { %v1354_v6 = vpack.c.bf16 %v1308_v5, %v1307_v4 }
 0x18b   : > { %v1063_v8 = vpop.f32.mrb[72].mxu0 }
 0x18c   : > { %v1245_v12 = vadd.f32 %v3534_v29, %v1063_v8  ;;  %v3665_v14 = vpop.f32.mrb[73].mxu0  ;;  %2945 = vmatmul.mubr.bf16.gmra.mrb[32].mxu1 %v1354_v6 }
 0x18d   : > { %v1067_v16 = vpop.f32.mrb[74].mxu0 }
 0x18e   : > { %v1246_v17 = vadd.f32 %v3534_v29, %v1067_v16  ;;  %v3668_v18 = vpop.f32.mrb[75].mxu0  ;;  %v1309_v21 = vmax.f32 %v1245_v12, 0.0 }
 0x190   : > { %v1310_v22 = vmax.f32 %v1246_v17, 0.0 }
 0x192   : > { %v1355_v2 = vpack.c.bf16 %v1310_v22, %v1309_v21 }
 0x193   : > { %v1073_v26 = vpop.f32.mrb[76].mxu0 }
 0x194   : > { %v1247_v30 = vadd.f32 %v3534_v29, %v1073_v26  ;;  %v3671_v33 = vpop.f32.mrb[77].mxu0  ;;  %2948 = vmatprep.mubr.bf16.mxu1 %v1355_v2 }
 0x195   : > { %v1077_v35 = vpop.f32.mrb[78].mxu0 }
 0x196   : > { %v1248_v37 = vadd.f32 %v3534_v29, %v1077_v35  ;;  %v3674_v39 = vpop.f32.mrb[79].mxu0  ;;  %v1311_v42 = vmax.f32 %v1247_v30, 0.0 }
 0x198   : > { %v1312_v44 = vmax.f32 %v1248_v37, 0.0 }
 0x19a   : > { %v1356_v48 = vpack.c.bf16 %v1312_v44, %v1311_v42 }
 0x19b   : > { %v1083_v52 = vpop.f32.mrb[80].mxu0 }
 0x19c   : > { %v1249_v53 = vadd.f32 %v3534_v29, %v1083_v52  ;;  %v3677_v55 = vpop.f32.mrb[81].mxu0  ;;  %2949 = vmatmul.mubr.bf16.gmra.mrb[36].mxu1 %v1356_v48 }
 0x19d   : > { %4272 = vst [vmem:[#allocation10_spill] sm:$0xff] %v3677_v55  ;;  %v1087_v56 = vpop.f32.mrb[82].mxu0 }
 0x19e   : > { %v1250_v60 = vadd.f32 %v3534_v29, %v1087_v56  ;;  %v3680_v63 = vpop.f32.mrb[83].mxu0  ;;  %v1313_v4 = vmax.f32 %v1249_v53, 0.0 }
 0x19f   : > { %4273 = vst [vmem:[#allocation11_spill] sm:$0xff] %v3680_v63 }
 0x1a0   : > { %v1314_v5 = vmax.f32 %v1250_v60, 0.0 }
 0x1a2   : > { %v1357_v6 = vpack.c.bf16 %v1314_v5, %v1313_v4 }
 0x1a3   : > { %v1093_v8 = vpop.f32.mrb[84].mxu0 }
 0x1a4   : > { %v1251_v12 = vadd.f32 %v3534_v29, %v1093_v8  ;;  %v3683_v16 = vpop.f32.mrb[85].mxu0  ;;  %2952 = vmatprep.mubr.bf16.mxu1 %v1357_v6 }
 0x1a5   : > { %4274 = vst [vmem:[#allocation12_spill] sm:$0xff] %v3683_v16  ;;  %v1097_v17 = vpop.f32.mrb[86].mxu0 }
 0x1a6   : > { %v1252_v21 = vadd.f32 %v3534_v29, %v1097_v17  ;;  %v3686_v22 = vpop.f32.mrb[87].mxu0  ;;  %v1315_v2 = vmax.f32 %v1251_v12, 0.0 }
 0x1a7   : > { %4275 = vst [vmem:[#allocation13_spill] sm:$0xff] %v3686_v22 }
 0x1a8   : > { %v1316_v26 = vmax.f32 %v1252_v21, 0.0 }
 0x1aa   : > { %v1358_v30 = vpack.c.bf16 %v1316_v26, %v1315_v2 }
 0x1ab   : > { %v1103_v35 = vpop.f32.mrb[88].mxu0 }
 0x1ac   : > { %v1253_v37 = vadd.f32 %v3534_v29, %v1103_v35  ;;  %v3689_v42 = vpop.f32.mrb[89].mxu0  ;;  %2953 = vmatmul.mubr.bf16.gmra.mrb[40].mxu1 %v1358_v30 }
 0x1ad   : > { %4276 = vst [vmem:[#allocation14_spill] sm:$0xff] %v3689_v42  ;;  %v1107_v44 = vpop.f32.mrb[90].mxu0 }
 0x1ae   : > { %v1254_v48 = vadd.f32 %v3534_v29, %v1107_v44  ;;  %v3692_v52 = vpop.f32.mrb[91].mxu0  ;;  %v1317_v53 = vmax.f32 %v1253_v37, 0.0 }
 0x1af   : > { %4277 = vst [vmem:[#allocation15_spill] sm:$0xff] %v3692_v52 }
 0x1b0   : > { %v1318_v56 = vmax.f32 %v1254_v48, 0.0 }
 0x1b2   : > { %v1359_v60 = vpack.c.bf16 %v1318_v56, %v1317_v53 }
 0x1b3   : > { %v1113_v4 = vpop.f32.mrb[92].mxu0 }
 0x1b4   : > { %v1255_v5 = vadd.f32 %v3534_v29, %v1113_v4  ;;  %v3695_v6 = vpop.f32.mrb[93].mxu0  ;;  %2956 = vmatprep.mubr.bf16.mxu1 %v1359_v60 }
 0x1b5   : > { %4278 = vst [vmem:[#allocation16_spill] sm:$0xff] %v3695_v6  ;;  %v1117_v8 = vpop.f32.mrb[94].mxu0 }
 0x1b6   : > { %v1256_v12 = vadd.f32 %v3534_v29, %v1117_v8  ;;  %v3698_v17 = vpop.f32.mrb[95].mxu0  ;;  %v1319_v21 = vmax.f32 %v1255_v5, 0.0 }
 0x1b7   : > { %4279 = vst [vmem:[#allocation17_spill] sm:$0xff] %v3698_v17 }
 0x1b8   : > { %v1320_v2 = vmax.f32 %v1256_v12, 0.0 }
 0x1ba   : > { %v1360_v26 = vpack.c.bf16 %v1320_v2, %v1319_v21 }
 0x1bb   : > { %v1123_v30 = vpop.f32.mrb[96].mxu0 }
 0x1bc   : > { %v1257_v35 = vadd.f32 %v3534_v29, %v1123_v30  ;;  %v3701_v37 = vpop.f32.mrb[97].mxu0  ;;  %2957 = vmatmul.mubr.bf16.gmra.mrb[44].mxu1 %v1360_v26 }
 0x1bd   : > { %4280 = vst [vmem:[#allocation18_spill] sm:$0xff] %v3701_v37  ;;  %v1127_v44 = vpop.f32.mrb[98].mxu0 }
 0x1be   : > { %v1258_v48 = vadd.f32 %v3534_v29, %v1127_v44  ;;  %v3704_v53 = vpop.f32.mrb[99].mxu0  ;;  %v1321_v56 = vmax.f32 %v1257_v35, 0.0 }
 0x1bf   : > { %4281 = vst [vmem:[#allocation19_spill] sm:$0xff] %v3704_v53 }
 0x1c0   : > { %v1322_v60 = vmax.f32 %v1258_v48, 0.0 }
 0x1c2   : > { %v1361_v4 = vpack.c.bf16 %v1322_v60, %v1321_v56 }
 0x1c3   : > { %v1133_v8 = vpop.f32.mrb[100].mxu0 }
 0x1c4   : > { %v1259_v52 = vadd.f32 %v3534_v29, %v1133_v8  ;;  %v3707_v5 = vpop.f32.mrb[101].mxu0  ;;  %2960 = vmatprep.mubr.bf16.mxu1 %v1361_v4 }
 0x1c5   : > { %4282 = vst [vmem:[#allocation20_spill] sm:$0xff] %v3707_v5  ;;  %v1137_v12 = vpop.f32.mrb[102].mxu0 }
 0x1c6   : > { %v1260_v21 = vadd.f32 %v3534_v29, %v1137_v12  ;;  %v3710_v2 = vpop.f32.mrb[103].mxu0  ;;  %v1323_v26 = vmax.f32 %v1259_v52, 0.0 }
 0x1c7   : > { %4283 = vst [vmem:[#allocation21_spill] sm:$0xff] %v3710_v2 }
 0x1c8   : > { %v1324_v30 = vmax.f32 %v1260_v21, 0.0 }
 0x1ca   : > { %v1362_v37 = vpack.c.bf16 %v1324_v30, %v1323_v26 }
 0x1cb   : > { %v1143_v44 = vpop.f32.mrb[104].mxu0 }
 0x1cc   : > { %v1261_v53 = vadd.f32 %v3534_v29, %v1143_v44  ;;  %v3713_v35 = vpop.f32.mrb[105].mxu0  ;;  %2961 = vmatmul.mubr.bf16.gmra.mrb[48].mxu1 %v1362_v37 }
 0x1cd   : > { %4284 = vst [vmem:[#allocation22_spill] sm:$0xff] %v3713_v35  ;;  %v1147_v48 = vpop.f32.mrb[106].mxu0 }
 0x1ce   : > { %v1262_v56 = vadd.f32 %v3534_v29, %v1147_v48  ;;  %v3716_v60 = vpop.f32.mrb[107].mxu0  ;;  %v1325_v4 = vmax.f32 %v1261_v53, 0.0 }
 0x1cf   : > { %4285 = vst [vmem:[#allocation23_spill] sm:$0xff] %v3716_v60 }
 0x1d0   : > { %v1326_v8 = vmax.f32 %v1262_v56, 0.0 }
 0x1d2   : > { %v1363_v5 = vpack.c.bf16 %v1326_v8, %v1325_v4  ;;  %v3730_v4 = vld [vmem:[%s4224_s6] ss:$0 sm:$0xff] }
 0x1d3   : > { %v1153_v12 = vpop.f32.mrb[108].mxu0 }
 0x1d4   : > { %v1263_v2 = vadd.f32 %v3534_v29, %v1153_v12  ;;  %v3719_v52 = vpop.f32.mrb[109].mxu0  ;;  %2964 = vmatprep.mubr.bf16.mxu1 %v1363_v5 }
 0x1d5   : > { %4286 = vst [vmem:[#allocation24_spill] sm:$0xff] %v3719_v52  ;;  %v1157_v21 = vpop.f32.mrb[110].mxu0 }
 0x1d6   : > { %v1264_v26 = vadd.f32 %v3534_v29, %v1157_v21  ;;  %v3722_v30 = vpop.f32.mrb[111].mxu0  ;;  %v1327_v37 = vmax.f32 %v1263_v2, 0.0 }
 0x1d7   : > { %4287 = vst [vmem:[#allocation25_spill] sm:$0xff] %v3722_v30 }
 0x1d8   : > { %v1328_v44 = vmax.f32 %v1264_v26, 0.0 }
 0x1da   : > { %v1364_v35 = vpack.c.bf16 %v1328_v44, %v1327_v37 }
 0x1db   : > { %v1163_v48 = vpop.f32.mrb[112].mxu0 }
 0x1dc   : > { %v1265_v60 = vadd.f32 %v3534_v29, %v1163_v48  ;;  %v3725_v53 = vpop.f32.mrb[113].mxu0  ;;  %2965 = vmatmul.mubr.bf16.gmra.mrb[52].mxu1 %v1364_v35 }
 0x1dd   : > { %4288 = vst [vmem:[#allocation26_spill] sm:$0xff] %v3725_v53  ;;  %v1167_v56 = vpop.f32.mrb[114].mxu0 }
 0x1de   : > { %v1266_v5 = vadd.f32 %v3534_v29, %v1167_v56  ;;  %v3733_v8 = vpop.f32.mrb[115].mxu0  ;;  %v1329_v2 = vmax.f32 %v1265_v60, 0.0 }
 0x1df   : > { %4289 = vst [vmem:[#allocation27_spill] sm:$0xff] %v3733_v8  ;;  %v2914_v12 = vpop.f32.mrb[0].mxu1 }
 0x1e0   : > { %v1330_v21 = vmax.f32 %v1266_v5, 0.0  ;;  %v1483_v26 = vadd.f32 %v2914_v12, %v3730_v4  ;;  %v1474_v37 = vpop.f32.mrb[1].mxu1 }
 0x1e1   : > { %v1475_v44 = vadd.f32 %v3730_v4, %v1474_v37  ;;  %v2915_v48 = vpop.f32.mrb[2].mxu1 }
 0x1e2   : > { %v1365_v35 = vpack.c.bf16 %v1330_v21, %v1329_v2  ;;  %v1731_v53 = vmax.f32 %v1483_v26, 0.0  ;;  %v1486_v30 = vadd.f32 %v2915_v48, %v3730_v4  ;;  %v1477_v52 = vpop.f32.mrb[3].mxu1 }
 0x1e3   : > { %v1729_v56 = vmax.f32 %v1475_v44, 0.0  ;;  %v1478_v8 = vadd.f32 %v3730_v4, %v1477_v52  ;;  %v1173_v60 = vpop.f32.mrb[116].mxu0 }
 0x1e4   : > { %v3741_v5 = vsel %vm1795_vm2, %v1731_v53, -1e+30  ;;  %v1992_v12 = vmul.f32 %v1731_v53, %v3550_v46  ;;  %v1732_v17 = vmax.f32 %v1486_v30, 0.0  ;;  %v1267_v37 = vadd.f32 %v3534_v29, %v1173_v60  ;;  %v3745_v2 = vpop.f32.mrb[117].mxu0  ;;  %2968 = vmatprep.mubr.bf16.mxu1 %v1365_v35 }
 0x1e5   : > { %4290 = vst [vmem:[#allocation28_spill] sm:$0xff] %v3745_v2  ;;  %v3748_v21 = vsel %vm1793_vm1, %v1729_v56, -1e+30  ;;  %v1990_v26 = vmul.f32 %v1729_v56, %v3540_v34  ;;  %v1730_v44 = vmax.f32 %v1478_v8, 0.0  ;;  %v1177_v48 = vpop.f32.mrb[118].mxu0  ;;  %vm1809_vm1 = vcmp.gt.f32.partialorder %v3605_v61, 0.5 }
 0x1e6   : > { %v3752_v52 = vsel %vm1796_vm3, %v1732_v17, -1e+30  ;;  %v1993_v46 = vmul.f32 %v1732_v17, %v3553_v50  ;;  %v1268_v30 = vadd.f32 %v3534_v29, %v1177_v48  ;;  %v3756_v53 = vpop.f32.mrb[119].mxu0  ;;  %v1331_v2 = vmax.f32 %v1267_v37, 0.0 }
 0x1e7   : > { %4291 = vst [vmem:[#allocation29_spill] sm:$0xff] %v3756_v53  ;;  %v3758_v60 = vsel %vm1794_vm4, %v1730_v44, -1e+30  ;;  %v1991_v35 = vmul.f32 %v1730_v44, %v3543_v38  ;;  %vm1811_vm2 = vcmp.gt.f32.partialorder %v3611_v9, 0.5  ;;  %vm1812_vm3 = vcmp.gt.f32.partialorder %v3614_v13, 0.5 }
 0x1e8   : > { %v1332_v6 = vmax.f32 %v1268_v30, 0.0  ;;  %vm1810_vm4 = vcmp.gt.f32.partialorder %v3608_v1, 0.5 }
 0x1e9   : > { %v2054_v42 = vadd.f32 %v1991_v35, %v1990_v26 }
 0x1ea   : > { %v1366_v34 = vpack.c.bf16 %v1332_v6, %v1331_v2 }
 0x1eb   : > { %v2055_v8 = vadd.f32 %v2054_v42, %v1992_v12  ;;  %v1183_v56 = vpop.f32.mrb[120].mxu0 }
 0x1ec   : > { %v1269_v63 = vadd.f32 %v3534_v29, %v1183_v56  ;;  %v3762_v22 = vpop.f32.mrb[121].mxu0  ;;  %2969 = vmatmul.mubr.bf16.gmra.mrb[56].mxu1 %v1366_v34 }
 0x1ed   : > { %v1187_v50 = vpop.f32.mrb[122].mxu0  ;;  %v2056_v17 = vadd.f32 %v2055_v8, %v1993_v46 }
 0x1ee   : > { %v1270_v48 = vadd.f32 %v3534_v29, %v1187_v50  ;;  %v3765_v53 = vpop.f32.mrb[123].mxu0  ;;  %v1333_v55 = vmax.f32 %v1269_v63, 0.0 }
 0x1ef   : > { %v2918_v16 = vpop.f32.mrb[4].mxu1 }
 0x1f0   : > { %v1334_v38 = vmax.f32 %v1270_v48, 0.0  ;;  %v1499_v37 = vadd.f32 %v2918_v16, %v3730_v4  ;;  %v1490_v26 = vpop.f32.mrb[5].mxu1 }
 0x1f1   : > { %v1491_v42 = vadd.f32 %v3730_v4, %v1490_v26  ;;  %v2919_v6 = vpop.f32.mrb[6].mxu1 }
 0x1f2   : > { %v1367_v12 = vpack.c.bf16 %v1334_v38, %v1333_v55  ;;  %v1735_v2 = vmax.f32 %v1499_v37, 0.0  ;;  %v1502_v44 = vadd.f32 %v2919_v6, %v3730_v4  ;;  %v1493_v46 = vpop.f32.mrb[7].mxu1 }
 0x1f3   : > { %v1733_v30 = vmax.f32 %v1491_v42, 0.0  ;;  %v1494_v63 = vadd.f32 %v3730_v4, %v1493_v46  ;;  %v1193_v35 = vpop.f32.mrb[124].mxu0 }
 0x1f4   : > { %v1863_v16 = vsel %vm1799_vm7, %v1735_v2, -1e+30  ;;  %v1996_v34 = vmul.f32 %v1735_v2, %v3570_v7  ;;  %v1736_v8 = vmax.f32 %v1502_v44, 0.0  ;;  %v3776_v56 = vpop.f32.mrb[125].mxu0  ;;  %2972 = vmatprep.mubr.bf16.mxu1 %v1367_v12  ;;  %v1271_v7 = vadd.f32 %v3534_v29, %v1193_v35  ;;  %v3120_v35 = vld [vmem:[%s4225_s7] sm:$0xff]  }
 0x1f5   : > { %v1923_v55 = vmax.f32 %v3741_v5, %v1863_v16  ;;  %v1861_v50 = vsel %vm1797_vm5, %v1733_v30, -1e+30  ;;  %v1994_v48 = vmul.f32 %v1733_v30, %v3560_v58  ;;  %v1734_v38 = vmax.f32 %v1494_v63, 0.0  ;;  %v1197_v37 = vpop.f32.mrb[126].mxu0 }
 0x1f6   : > { %v1921_v26 = vmax.f32 %v3748_v21, %v1861_v50  ;;  %v1864_v42 = vsel %vm1800_vm8, %v1736_v8, -1e+30  ;;  %v1997_v6 = vmul.f32 %v1736_v8, %v3573_v11  ;;  %v3785_v2 = vpop.f32.mrb[127].mxu0  ;;  %v1272_v30 = vadd.f32 %v3534_v29, %v1197_v37 }
 0x1f7   : > { %v2057_v44 = vadd.f32 %v2056_v17, %v1994_v48  ;;  %v1924_v12 = vmax.f32 %v3752_v52, %v1864_v42  ;;  %v1862_v5 = vsel %vm1798_vm6, %v1734_v38, -1e+30  ;;  %v1995_v46 = vmul.f32 %v1734_v38, %v3563_v62 }
 0x1f8   : > { %v1922_v58 = vmax.f32 %v3758_v60, %v1862_v5  ;;  %v1335_v63 = vmax.f32 %v1271_v7, 0.0  ;;  %v1336_v16 = vmax.f32 %v1272_v30, 0.0  ;;  %v3228_v8 = vmov 0.0  }
 0x1f9   : > { %v2058_v21 = vadd.f32 %v2057_v44, %v1995_v46  ;;  %2976 = vmatprep.subr.bf16.mxu1 %v3228_v8  ;;  %2128 = vst [vmem:[#allocation3] sm:$0x1] %v3228_v8  ;;  %vm1813_vm5 = vcmp.gt.f32.partialorder %v3617_v20, 0.5  ;;  %vm1815_vm6 = vcmp.gt.f32.partialorder %v3623_v31, 0.5  ;;  %vm1816_vm7 = vcmp.gt.f32.partialorder %v3626_v36, 0.5 }
 0x1fa   : > { %v1368_v17 = vpack.c.bf16 %v1336_v16, %v1335_v63  ;;  %2977 = vmatpush3.bf16.msra.mxu1 %v3120_v35  ;;  %vm1814_vm8 = vcmp.gt.f32.partialorder %v3620_v24, 0.5 }
 0x1fb   : > { %v2059_v11 = vadd.f32 %v2058_v21, %v1996_v34  ;;  %2978 = vmatprep.subr.bf16.mxu1 %v3228_v8 }
 0x1fc   : > { %2973 = vmatmul.mubr.bf16.gmra.mrb[60].mxu1 %v1368_v17 }
 0x1fd   : > { %v2060_v52 = vadd.f32 %v2059_v11, %v1997_v6 }
 0x1ff   : > { %v2922_v29 = vpop.f32.mrb[8].mxu1 }
 0x200   : > { %v1515_v62 = vadd.f32 %v2922_v29, %v3730_v4  ;;  %v1506_v60 = vpop.f32.mrb[9].mxu1 }
 0x201   : > { %v1507_v34 = vadd.f32 %v3730_v4, %v1506_v60  ;;  %v2923_v50 = vpop.f32.mrb[10].mxu1 }
 0x202   : > { %v1739_v48 = vmax.f32 %v1515_v62, 0.0  ;;  %v1518_v38 = vadd.f32 %v2923_v50, %v3730_v4  ;;  %v1509_v37 = vpop.f32.mrb[11].mxu1 }
 0x203   : > { %v1737_v42 = vmax.f32 %v1507_v34, 0.0  ;;  %v1510_v6 = vadd.f32 %v3730_v4, %v1509_v37 }
 0x204   : > { %v1867_v7 = vsel %vm1803_vm10, %v1739_v48, -1e+30  ;;  %v2000_v44 = vmul.f32 %v1739_v48, %v3587_v28  ;;  %v1740_v5 = vmax.f32 %v1518_v38, 0.0  ;;  %vm1819_vm10 = vcmp.gt.f32.partialorder %v3635_v59, 0.5 }
 0x205   : > { %v3807_v46 = vmax.f32 %v1923_v55, %v1867_v7  ;;  %v1865_v30 = vsel %vm1801_vm9, %v1737_v42, -1e+30  ;;  %v1998_v21 = vmul.f32 %v1737_v42, %v3580_v19  ;;  %v1738_v63 = vmax.f32 %v1510_v6, 0.0  ;;  %v3121_v19 = vld [vmem:[%s4225_s7 + $0x8] sm:$0xff]  }
 0x206   : > { %v3811_v16 = vmax.f32 %v1921_v26, %v1865_v30  ;;  %v1868_v11 = vsel %vm1804_vm11, %v1740_v5, -1e+30  ;;  %v2001_v35 = vmul.f32 %v1740_v5, %v3590_v32  ;;  %2979 = vmatpush3.bf16.msra.mxu1 %v3121_v19  ;;  %vm1817_vm9 = vcmp.gt.f32.partialorder %v3629_v45, 0.5 }
 0x207   : > { %v2061_v17 = vadd.f32 %v2060_v52, %v1998_v21  ;;  %v3814_v29 = vmax.f32 %v1924_v12, %v1868_v11  ;;  %v1866_v62 = vsel %vm1802_vm12, %v1738_v63, -1e+30  ;;  %v1999_v28 = vmul.f32 %v1738_v63, %v3583_v23  ;;  %2980 = vmatprep.subr.bf16.mxu1 %v3228_v8 }
 0x208   : > { %v3817_v60 = vmax.f32 %v1922_v58, %v1866_v62  ;;  %vm1820_vm11 = vcmp.gt.f32.partialorder %v3638_v0, 0.5  ;;  %vm1818_vm12 = vcmp.gt.f32.partialorder %v3632_v49, 0.5 }
 0x209   : > { %v2062_v55 = vadd.f32 %v2061_v17, %v1999_v28 }
 0x20b   : > { %v2063_v34 = vadd.f32 %v2062_v55, %v2000_v44 }
 0x20d   : > { %v2064_v50 = vadd.f32 %v2063_v34, %v2001_v35 }
 0x20f   : > { %v2926_v26 = vpop.f32.mrb[12].mxu1 }
 0x210   : > { %v1531_v32 = vadd.f32 %v2926_v26, %v3730_v4  ;;  %v1522_v12 = vpop.f32.mrb[13].mxu1 }
 0x211   : > { %v1523_v52 = vadd.f32 %v3730_v4, %v1522_v12  ;;  %v2927_v48 = vpop.f32.mrb[14].mxu1 }
 0x212   : > { %v1743_v23 = vmax.f32 %v1531_v32, 0.0  ;;  %v1534_v58 = vadd.f32 %v2927_v48, %v3730_v4  ;;  %v1525_v38 = vpop.f32.mrb[15].mxu1 }
 0x213   : > { %v1741_v37 = vmax.f32 %v1523_v52, 0.0  ;;  %v1526_v42 = vadd.f32 %v3730_v4, %v1525_v38 }
 0x214   : > { %v1871_v6 = vsel %vm1807_vm14, %v1743_v23, -1e+30  ;;  %v2004_v7 = vmul.f32 %v1743_v23, %v3599_v51  ;;  %v1744_v44 = vmax.f32 %v1534_v58, 0.0  ;;  %vm1823_vm14 = vcmp.gt.f32.partialorder %v3647_v25, 0.5 }
 0x215   : > { %v1931_v5 = vmax.f32 %v3807_v46, %v1871_v6  ;;  %v1869_v30 = vsel %vm1805_vm13, %v1741_v37, -1e+30  ;;  %v2002_v21 = vmul.f32 %v1741_v37, %v3593_v40  ;;  %v1742_v63 = vmax.f32 %v1526_v42, 0.0  ;;  %v3122_v40 = vld [vmem:[%s4225_s7 + $0x10] sm:$0xff]  }
 0x216   : > { %v1929_v11 = vmax.f32 %v3811_v16, %v1869_v30  ;;  %v1872_v35 = vsel %vm1808_vm15, %v1744_v44, -1e+30  ;;  %v2005_v17 = vmul.f32 %v1744_v44, %v3602_v54  ;;  %2981 = vmatpush3.bf16.msra.mxu1 %v3122_v40  ;;  %vm1821_vm13 = vcmp.gt.f32.partialorder %v3641_v10, 0.5 }
 0x217   : > { %v2065_v62 = vadd.f32 %v2064_v50, %v2002_v21  ;;  %v1932_v28 = vmax.f32 %v3814_v29, %v1872_v35  ;;  %v1870_v55 = vsel %vm1806_vm0, %v1742_v63, -1e+30  ;;  %v2003_v51 = vmul.f32 %v1742_v63, %v3596_v43  ;;  %2982 = vmatprep.subr.bf16.mxu1 %v3228_v8 }
 0x218   : > { %v1930_v34 = vmax.f32 %v3817_v60, %v1870_v55  ;;  %vm1824_vm15 = vcmp.gt.f32.partialorder %v3650_v27, 0.5  ;;  %vm1822_vm0 = vcmp.gt.f32.partialorder %v3644_v15, 0.5 }
 0x219   : > { %v2066_v46 = vadd.f32 %v2065_v62, %v2003_v51 }
 0x21b   : > { %v2067_v19 = vadd.f32 %v2066_v46, %v2004_v7 }
 0x21d   : > { %v2068_v26 = vadd.f32 %v2067_v19, %v2005_v17 }
 0x21f   : > { %v2930_v16 = vpop.f32.mrb[16].mxu1 }
 0x220   : > { %v1547_v54 = vadd.f32 %v2930_v16, %v3730_v4  ;;  %v1538_v50 = vpop.f32.mrb[17].mxu1 }
 0x221   : > { %v1539_v29 = vadd.f32 %v3730_v4, %v1538_v50  ;;  %v2931_v32 = vpop.f32.mrb[18].mxu1 }
 0x222   : > { %v1747_v43 = vmax.f32 %v1547_v54, 0.0  ;;  %v1550_v60 = vadd.f32 %v2931_v32, %v3730_v4  ;;  %v1541_v12 = vpop.f32.mrb[19].mxu1 }
 0x223   : > { %v1745_v52 = vmax.f32 %v1539_v29, 0.0  ;;  %v1542_v48 = vadd.f32 %v3730_v4, %v1541_v12 }
 0x224   : > { %v1875_v23 = vsel %vm1811_vm2, %v1747_v43, -1e+30  ;;  %v2008_v58 = vmul.f32 %v1747_v43, %v3611_v9  ;;  %v1748_v38 = vmax.f32 %v1550_v60, 0.0  ;;  %vm1827_vm2 = vcmp.gt.f32.partialorder %v3659_v57, 0.5 }
 0x225   : > { %v3851_v37 = vmax.f32 %v1931_v5, %v1875_v23  ;;  %v1873_v42 = vsel %vm1809_vm1, %v1745_v52, -1e+30  ;;  %v2006_v6 = vmul.f32 %v1745_v52, %v3605_v61  ;;  %v1746_v7 = vmax.f32 %v1542_v48, 0.0  ;;  %v3123_v61 = vld [vmem:[%s4225_s7 + $0x18] sm:$0xff]  }
 0x226   : > { %v3855_v44 = vmax.f32 %v1929_v11, %v1873_v42  ;;  %v1876_v30 = vsel %vm1812_vm3, %v1748_v38, -1e+30  ;;  %v2009_v21 = vmul.f32 %v1748_v38, %v3614_v13  ;;  %2983 = vmatpush3.bf16.msra.mxu1 %v3123_v61  ;;  %vm1825_vm1 = vcmp.gt.f32.partialorder %v3653_v41, 0.5 }
 0x227   : > { %v2069_v63 = vadd.f32 %v2068_v26, %v2006_v6  ;;  %v3858_v35 = vmax.f32 %v1932_v28, %v1876_v30  ;;  %v1874_v17 = vsel %vm1810_vm4, %v1746_v7, -1e+30  ;;  %v2007_v9 = vmul.f32 %v1746_v7, %v3608_v1  ;;  %2984 = vmatprep.subr.bf16.mxu1 %v3228_v8 }
 0x228   : > { %v3861_v62 = vmax.f32 %v1930_v34, %v1874_v17  ;;  %vm1828_vm3 = vcmp.gt.f32.partialorder %v3662_v3, 0.5  ;;  %vm1826_vm4 = vcmp.gt.f32.partialorder %v3656_v47, 0.5 }
 0x229   : > { %v2070_v5 = vadd.f32 %v2069_v63, %v2007_v9 }
 0x22b   : > { %v2071_v55 = vadd.f32 %v2070_v5, %v2008_v58 }
 0x22d   : > { %v2072_v51 = vadd.f32 %v2071_v55, %v2009_v21 }
 0x22f   : > { %v2934_v11 = vpop.f32.mrb[20].mxu1 }
 0x230   : > { %v1563_v13 = vadd.f32 %v2934_v11, %v3730_v4  ;;  %v1554_v28 = vpop.f32.mrb[21].mxu1 }
 0x231   : > { %v1555_v46 = vadd.f32 %v3730_v4, %v1554_v28  ;;  %v2935_v19 = vpop.f32.mrb[22].mxu1 }
 0x232   : > { %v1751_v1 = vmax.f32 %v1563_v13, 0.0  ;;  %v1566_v34 = vadd.f32 %v2935_v19, %v3730_v4  ;;  %v1557_v40 = vpop.f32.mrb[23].mxu1 }
 0x233   : > { %v1749_v26 = vmax.f32 %v1555_v46, 0.0  ;;  %v1558_v16 = vadd.f32 %v3730_v4, %v1557_v40 }
 0x234   : > { %v1879_v54 = vsel %vm1815_vm6, %v1751_v1, -1e+30  ;;  %v2012_v50 = vmul.f32 %v1751_v1, %v3623_v31  ;;  %v1752_v29 = vmax.f32 %v1566_v34, 0.0  ;;  %vm1829_vm6 = vcmp.gt.f32.partialorder %v3665_v14, 0.5 }
 0x235   : > { %v1939_v32 = vmax.f32 %v3851_v37, %v1879_v54  ;;  %v1877_v43 = vsel %vm1813_vm5, %v1749_v26, -1e+30  ;;  %v2010_v60 = vmul.f32 %v1749_v26, %v3617_v20  ;;  %v1750_v12 = vmax.f32 %v1558_v16, 0.0  ;;  %v3124_v20 = vld [vmem:[%s4225_s7 + $0x20] sm:$0xff]  }
 0x236   : > { %v1937_v52 = vmax.f32 %v3855_v44, %v1877_v43  ;;  %v1880_v48 = vsel %vm1816_vm7, %v1752_v29, -1e+30  ;;  %v2013_v23 = vmul.f32 %v1752_v29, %v3626_v36  ;;  %2985 = vmatpush3.bf16.msra.mxu1 %v3124_v20  ;;  %vm3230_vm5 = vmmov 0  }
 0x237   : > { %v2073_v58 = vadd.f32 %v2072_v51, %v2010_v60  ;;  %v1940_v38 = vmax.f32 %v3858_v35, %v1880_v48  ;;  %v1878_v42 = vsel %vm1814_vm8, %v1750_v12, -1e+30  ;;  %v2011_v31 = vmul.f32 %v1750_v12, %v3620_v24  ;;  %2986 = vmatprep.subr.bf16.mxu1 %v3228_v8  ;;  %2992 = vmatprep.mubr.msk.bf16.mxu1 %vm3230_vm5, %v3228_v8 }
 0x238   : > { %v1938_v6 = vmax.f32 %v3861_v62, %v1878_v42  ;;  %vm1831_vm7 = vcmp.gt.f32.partialorder %v3671_v33, 0.5  ;;  %vm1832_vm8 = vcmp.gt.f32.partialorder %v3674_v39, 0.5 }
 0x239   : > { %v2074_v37 = vadd.f32 %v2073_v58, %v2011_v31 }
 0x23b   : > { %v2075_v7 = vadd.f32 %v2074_v37, %v2012_v50 }
 0x23d   : > { %v2076_v30 = vadd.f32 %v2075_v7, %v2013_v23 }
 0x23f   : > { %v2938_v44 = vpop.f32.mrb[24].mxu1 }
 0x240   : > { %v1579_v36 = vadd.f32 %v2938_v44, %v3730_v4  ;;  %v1570_v21 = vpop.f32.mrb[25].mxu1 }
 0x241   : > { %v1571_v63 = vadd.f32 %v3730_v4, %v1570_v21  ;;  %v2939_v35 = vpop.f32.mrb[26].mxu1 }
 0x242   : > { %v1755_v24 = vmax.f32 %v1579_v36, 0.0  ;;  %v1582_v17 = vadd.f32 %v2939_v35, %v3730_v4  ;;  %v1573_v9 = vpop.f32.mrb[27].mxu1 }
 0x243   : > { %v1753_v62 = vmax.f32 %v1571_v63, 0.0  ;;  %v1574_v5 = vadd.f32 %v3730_v4, %v1573_v9 }
 0x244   : > { %v1883_v55 = vsel %vm1819_vm10, %v1755_v24, -1e+30  ;;  %v2016_v61 = vmul.f32 %v1755_v24, %v3635_v59  ;;  %v1756_v51 = vmax.f32 %v1582_v17, 0.0 }
 0x245   : > { %v3895_v11 = vmax.f32 %v1939_v32, %v1883_v55  ;;  %v1881_v13 = vsel %vm1817_vm9, %v1753_v62, -1e+30  ;;  %v2014_v28 = vmul.f32 %v1753_v62, %v3629_v45  ;;  %v1754_v46 = vmax.f32 %v1574_v5, 0.0  ;;  %v3125_v45 = vld [vmem:[%s4225_s7 + $0x28] sm:$0xff]  }
 0x246   : > { %v3899_v19 = vmax.f32 %v1937_v52, %v1881_v13  ;;  %v1884_v1 = vsel %vm1820_vm11, %v1756_v51, -1e+30  ;;  %v2017_v34 = vmul.f32 %v1756_v51, %v3638_v0  ;;  %2987 = vmatpush3.bf16.msra.mxu1 %v3125_v45  ;;  %vm1830_vm9 = vcmp.gt.f32.partialorder %v3668_v18, 0.5 }
 0x247   : > { %v2077_v40 = vadd.f32 %v2076_v30, %v2014_v28  ;;  %v3902_v26 = vmax.f32 %v1940_v38, %v1884_v1  ;;  %v1882_v16 = vsel %vm1818_vm12, %v1754_v46, -1e+30  ;;  %v2015_v59 = vmul.f32 %v1754_v46, %v3632_v49  ;;  %2988 = vmatprep.subr.bf16.mxu1 %v3228_v8 }
 0x248   : > { %v3905_v54 = vmax.f32 %v1938_v6, %v1882_v16 }
 0x249   : > { %v2078_v50 = vadd.f32 %v2077_v40, %v2015_v59 }
 0x24b   : > { %v2079_v29 = vadd.f32 %v2078_v50, %v2016_v61 }
 0x24d   : > { %v2080_v32 = vadd.f32 %v2079_v29, %v2017_v34 }
 0x24f   : > { %v2942_v43 = vpop.f32.mrb[28].mxu1 }
 0x250   : > { %v1595_v0 = vadd.f32 %v2942_v43, %v3730_v4  ;;  %v1586_v60 = vpop.f32.mrb[29].mxu1 }
 0x251   : > { %v1587_v12 = vadd.f32 %v3730_v4, %v1586_v60  ;;  %v2943_v52 = vpop.f32.mrb[30].mxu1 }
 0x252   : > { %v1759_v49 = vmax.f32 %v1595_v0, 0.0  ;;  %v1598_v48 = vadd.f32 %v2943_v52, %v3730_v4  ;;  %v1589_v23 = vpop.f32.mrb[31].mxu1 }
 0x253   : > { %v1757_v58 = vmax.f32 %v1587_v12, 0.0  ;;  %v1590_v38 = vadd.f32 %v3730_v4, %v1589_v23 }
 0x254   : > { %v1887_v42 = vsel %vm1823_vm14, %v1759_v49, -1e+30  ;;  %v2020_v31 = vmul.f32 %v1759_v49, %v3647_v25  ;;  %v1760_v6 = vmax.f32 %v1598_v48, 0.0  ;;  %v3126_v48 = vld [vmem:[%s4225_s7 + $0x30] sm:$0xff]  }
 0x255   : > { %v1947_v37 = vmax.f32 %v3895_v11, %v1887_v42  ;;  %v1885_v7 = vsel %vm1821_vm13, %v1757_v58, -1e+30  ;;  %v2018_v20 = vmul.f32 %v1757_v58, %v3641_v10  ;;  %v1758_v30 = vmax.f32 %v1590_v38, 0.0  ;;  %2989 = vmatpush3.bf16.msra.mxu1 %v3126_v48  ;;  %v3127_v38 = vld [vmem:[%s4225_s7 + $0x38] sm:$0xff]  }
 0x256   : > { %v1945_v44 = vmax.f32 %v3899_v19, %v1885_v7  ;;  %v1888_v36 = vsel %vm1824_vm15, %v1760_v6, -1e+30  ;;  %v2021_v21 = vmul.f32 %v1760_v6, %v3650_v27  ;;  %2990 = vmatprep.subr.bf16.mxu1 %v3228_v8 }
 0x257   : > { %v2081_v63 = vadd.f32 %v2080_v32, %v2018_v20  ;;  %v1948_v35 = vmax.f32 %v3902_v26, %v1888_v36  ;;  %v1886_v24 = vsel %vm1822_vm0, %v1758_v30, -1e+30  ;;  %v2019_v25 = vmul.f32 %v1758_v30, %v3644_v15 }
 0x258   : > { %v1946_v17 = vmax.f32 %v3905_v54, %v1886_v24  ;;  %v3229_v54 = vmov -1e+30  }
 0x259   : > { %v2082_v9 = vadd.f32 %v2081_v63, %v2019_v25  ;;  %2127 = vst [vmem:[#allocation2] sm:$0x1] %v3229_v54  ;;  %2991 = vmatpush3.bf16.msra.mxu1 %v3127_v38 }
 0x25a   : > { %2996 = vmatprep.subr.bf16.mxu1 %v3228_v8 }
 0x25b   : > { %v2083_v62 = vadd.f32 %v2082_v9, %v2020_v31 }
 0x25d   : > { %v2084_v5 = vadd.f32 %v2083_v62, %v2021_v21 }
 0x25f   : > { %v2946_v10 = vpop.f32.mrb[32].mxu1 }
 0x260   : > { %v1611_v55 = vadd.f32 %v2946_v10, %v3730_v4  ;;  %v1602_v61 = vpop.f32.mrb[33].mxu1 }
 0x261   : > { %v1603_v51 = vadd.f32 %v3730_v4, %v1602_v61  ;;  %v2947_v11 = vpop.f32.mrb[34].mxu1 }
 0x262   : > { %v1763_v27 = vmax.f32 %v1611_v55, 0.0  ;;  %v1614_v13 = vadd.f32 %v2947_v11, %v3730_v4  ;;  %v1605_v28 = vpop.f32.mrb[35].mxu1 }
 0x263   : > { %v1761_v15 = vmax.f32 %v1603_v51, 0.0  ;;  %v1606_v46 = vadd.f32 %v3730_v4, %v1605_v28 }
 0x264   : > { %v1891_v19 = vsel %vm1827_vm2, %v1763_v27, -1e+30  ;;  %v2024_v1 = vmul.f32 %v1763_v27, %v3659_v57  ;;  %v1764_v34 = vmax.f32 %v1614_v13, 0.0 }
 0x265   : > { %v3935_v40 = vmax.f32 %v1947_v37, %v1891_v19  ;;  %v1889_v26 = vsel %vm1825_vm1, %v1761_v15, -1e+30  ;;  %v2022_v16 = vmul.f32 %v1761_v15, %v3653_v41  ;;  %v1762_v59 = vmax.f32 %v1606_v46, 0.0  ;;  %v4292_v19 = vld [vmem:[#allocation10_spill] sm:$0xff] }
 0x266   : > { %v3939_v50 = vmax.f32 %v1945_v44, %v1889_v26  ;;  %v1892_v29 = vsel %vm1828_vm3, %v1764_v34, -1e+30  ;;  %v2025_v45 = vmul.f32 %v1764_v34, %v3662_v3  ;;  %vm1833_vm10 = vcmp.gt.f32.partialorder %v4292_v19, 0.5 }
 0x267   : > { %v2085_v32 = vadd.f32 %v2084_v5, %v2022_v16  ;;  %v3942_v43 = vmax.f32 %v1948_v35, %v1892_v29  ;;  %v1890_v57 = vsel %vm1826_vm4, %v1762_v59, -1e+30  ;;  %v2023_v0 = vmul.f32 %v1762_v59, %v3656_v47 }
 0x268   : > { %v3945_v60 = vmax.f32 %v1946_v17, %v1890_v57 }
 0x269   : > { %v2086_v12 = vadd.f32 %v2085_v32, %v2023_v0  ;;  %v4295_v32 = vld [vmem:[#allocation11_spill] sm:$0xff] }
 0x26a   : > { %vm1834_vm13 = vcmp.gt.f32.partialorder %v4295_v32, 0.5 }
 0x26b   : > { %v2087_v41 = vadd.f32 %v2086_v12, %v2024_v1  ;;  %v4293_v1 = vld [vmem:[#allocation12_spill] sm:$0xff] }
 0x26c   : > { %vm1835_vm11 = vcmp.gt.f32.partialorder %v4293_v1, 0.5 }
 0x26d   : > { %v2088_v52 = vadd.f32 %v2087_v41, %v2025_v45 }
 0x26f   : > { %v2950_v49 = vpop.f32.mrb[36].mxu1 }
 0x270   : > { %v1627_v23 = vadd.f32 %v2950_v49, %v3730_v4  ;;  %v1618_v58 = vpop.f32.mrb[37].mxu1 }
 0x271   : > { %v1619_v3 = vadd.f32 %v3730_v4, %v1618_v58  ;;  %v2951_v47 = vpop.f32.mrb[38].mxu1 }
 0x272   : > { %v1767_v42 = vmax.f32 %v1627_v23, 0.0  ;;  %v1630_v31 = vadd.f32 %v2951_v47, %v3730_v4  ;;  %v1621_v6 = vpop.f32.mrb[39].mxu1 }
 0x273   : > { %v1765_v37 = vmax.f32 %v1619_v3, 0.0  ;;  %v1622_v7 = vadd.f32 %v3730_v4, %v1621_v6 }
 0x274   : > { %v1895_v20 = vsel %vm1831_vm7, %v1767_v42, -1e+30  ;;  %v2028_v30 = vmul.f32 %v1767_v42, %v3671_v33  ;;  %v1768_v44 = vmax.f32 %v1630_v31, 0.0 }
 0x275   : > { %v1955_v36 = vmax.f32 %v3935_v40, %v1895_v20  ;;  %v1893_v21 = vsel %vm1829_vm6, %v1765_v37, -1e+30  ;;  %v2026_v63 = vmul.f32 %v1765_v37, %v3665_v14  ;;  %v1766_v35 = vmax.f32 %v1622_v7, 0.0  ;;  %v4294_v40 = vld [vmem:[#allocation13_spill] sm:$0xff]  ;;  %v4296_v20 = vld [vmem:[#allocation14_spill] sm:$0xff] }
 0x276   : > { %v1953_v24 = vmax.f32 %v3939_v50, %v1893_v21  ;;  %v1896_v25 = vsel %vm1832_vm8, %v1768_v44, -1e+30  ;;  %v2029_v17 = vmul.f32 %v1768_v44, %v3674_v39  ;;  %vm1836_vm12 = vcmp.gt.f32.partialorder %v4294_v40, 0.5  ;;  %v4298_v21 = vld [vmem:[#allocation17_spill] sm:$0xff] }
 0x277   : > { %v2089_v9 = vadd.f32 %v2088_v52, %v2026_v63  ;;  %v1956_v33 = vmax.f32 %v3942_v43, %v1896_v25  ;;  %v1894_v62 = vsel %vm1830_vm9, %v1766_v35, -1e+30  ;;  %v2027_v5 = vmul.f32 %v1766_v35, %v3668_v18 }
 0x278   : > { %v1954_v10 = vmax.f32 %v3945_v60, %v1894_v62  ;;  %vm1837_vm14 = vcmp.gt.f32.partialorder %v4296_v20, 0.5  ;;  %vm1840_vm0 = vcmp.gt.f32.partialorder %v4298_v21, 0.5  ;;  %v4299_v62 = vld [vmem:[#allocation15_spill] sm:$0xff] }
 0x279   : > { %v2090_v14 = vadd.f32 %v2089_v9, %v2027_v5  ;;  %vm1838_vm1 = vcmp.gt.f32.partialorder %v4299_v62, 0.5 }
 0x27b   : > { %v2091_v55 = vadd.f32 %v2090_v14, %v2028_v30  ;;  %v4297_v30 = vld [vmem:[#allocation16_spill] sm:$0xff] }
 0x27c   : > { %vm1839_vm15 = vcmp.gt.f32.partialorder %v4297_v30, 0.5 }
 0x27d   : > { %v2092_v61 = vadd.f32 %v2091_v55, %v2029_v17 }
 0x27f   : > { %v2954_v51 = vpop.f32.mrb[40].mxu1 }
 0x280   : > { %v1643_v11 = vadd.f32 %v2954_v51, %v3730_v4  ;;  %v1634_v27 = vpop.f32.mrb[41].mxu1 }
 0x281   : > { %v1635_v13 = vadd.f32 %v3730_v4, %v1634_v27  ;;  %v2955_v39 = vpop.f32.mrb[42].mxu1 }
 0x282   : > { %v1771_v28 = vmax.f32 %v1643_v11, 0.0  ;;  %v1646_v15 = vadd.f32 %v2955_v39, %v3730_v4  ;;  %v1637_v46 = vpop.f32.mrb[43].mxu1 }
 0x283   : > { %v1769_v18 = vmax.f32 %v1635_v13, 0.0  ;;  %v1638_v34 = vadd.f32 %v3730_v4, %v1637_v46 }
 0x284   : > { %v1899_v26 = vsel %vm1835_vm11, %v1771_v28, -1e+30  ;;  %v2032_v16 = vmul.f32 %v1771_v28, %v4293_v1  ;;  %v1772_v59 = vmax.f32 %v1646_v15, 0.0 }
 0x285   : > { %v3981_v54 = vmax.f32 %v1955_v36, %v1899_v26  ;;  %v1897_v50 = vsel %vm1833_vm10, %v1769_v18, -1e+30  ;;  %v2030_v29 = vmul.f32 %v1769_v18, %v4292_v19  ;;  %v1770_v45 = vmax.f32 %v1638_v34, 0.0 }
 0x286   : > { %v3985_v43 = vmax.f32 %v1953_v24, %v1897_v50  ;;  %v1900_v57 = vsel %vm1836_vm12, %v1772_v59, -1e+30  ;;  %v2033_v0 = vmul.f32 %v1772_v59, %v4294_v40  ;;  %v4301_v59 = vld [vmem:[#allocation20_spill] sm:$0xff] }
 0x287   : > { %v2093_v60 = vadd.f32 %v2092_v61, %v2030_v29  ;;  %v3988_v12 = vmax.f32 %v1956_v33, %v1900_v57  ;;  %v1898_v41 = vsel %vm1834_vm13, %v1770_v45, -1e+30  ;;  %v2031_v52 = vmul.f32 %v1770_v45, %v4295_v32  ;;  %v4302_v29 = vld [vmem:[#allocation21_spill] sm:$0xff] }
 0x288   : > { %v3991_v49 = vmax.f32 %v1954_v10, %v1898_v41  ;;  %vm1843_vm3 = vcmp.gt.f32.partialorder %v4301_v59, 0.5  ;;  %vm1844_vm4 = vcmp.gt.f32.partialorder %v4302_v29, 0.5  ;;  %v4303_v41 = vld [vmem:[#allocation19_spill] sm:$0xff] }
 0x289   : > { %v2094_v48 = vadd.f32 %v2093_v60, %v2031_v52  ;;  %vm1842_vm6 = vcmp.gt.f32.partialorder %v4303_v41, 0.5 }
 0x28b   : > { %v2095_v23 = vadd.f32 %v2094_v48, %v2032_v16  ;;  %v4300_v16 = vld [vmem:[#allocation18_spill] sm:$0xff] }
 0x28c   : > { %vm1841_vm2 = vcmp.gt.f32.partialorder %v4300_v16, 0.5 }
 0x28d   : > { %v2096_v58 = vadd.f32 %v2095_v23, %v2033_v0 }
 0x28f   : > { %v2958_v3 = vpop.f32.mrb[44].mxu1 }
 0x290   : > { %v1659_v47 = vadd.f32 %v2958_v3, %v3730_v4  ;;  %v1650_v38 = vpop.f32.mrb[45].mxu1 }
 0x291   : > { %v1651_v42 = vadd.f32 %v3730_v4, %v1650_v38  ;;  %v2959_v31 = vpop.f32.mrb[46].mxu1 }
 0x292   : > { %v1775_v6 = vmax.f32 %v1659_v47, 0.0  ;;  %v1662_v37 = vadd.f32 %v2959_v31, %v3730_v4  ;;  %v1653_v7 = vpop.f32.mrb[47].mxu1 }
 0x293   : > { %v1773_v44 = vmax.f32 %v1651_v42, 0.0  ;;  %v1654_v36 = vadd.f32 %v3730_v4, %v1653_v7 }
 0x294   : > { %v1903_v63 = vsel %vm1839_vm15, %v1775_v6, -1e+30  ;;  %v2036_v35 = vmul.f32 %v1775_v6, %v4297_v30  ;;  %v1776_v24 = vmax.f32 %v1662_v37, 0.0  ;;  %vm1853_vm15 = vcmp.gt.f32.partialorder %v3762_v22, 0.5 }
 0x295   : > { %v1963_v25 = vmax.f32 %v3981_v54, %v1903_v63  ;;  %v1901_v17 = vsel %vm1837_vm14, %v1773_v44, -1e+30  ;;  %v2034_v9 = vmul.f32 %v1773_v44, %v4296_v20  ;;  %v1774_v33 = vmax.f32 %v1654_v36, 0.0 }
 0x296   : > { %v1961_v5 = vmax.f32 %v3985_v43, %v1901_v17  ;;  %v1904_v10 = vsel %vm1840_vm0, %v1776_v24, -1e+30  ;;  %v2037_v14 = vmul.f32 %v1776_v24, %v4298_v21  ;;  %v4305_v24 = vld [vmem:[#allocation24_spill] sm:$0xff]  ;;  %vm1855_vm0 = vcmp.gt.f32.partialorder %v3776_v56, 0.5 }
 0x297   : > { %v2097_v55 = vadd.f32 %v2096_v58, %v2034_v9  ;;  %v1964_v61 = vmax.f32 %v3988_v12, %v1904_v10  ;;  %v1902_v51 = vsel %vm1838_vm1, %v1774_v33, -1e+30  ;;  %v2035_v11 = vmul.f32 %v1774_v33, %v4299_v62  ;;  %v4306_v9 = vld [vmem:[#allocation25_spill] sm:$0xff] }
 0x298   : > { %v1962_v27 = vmax.f32 %v3991_v49, %v1902_v51  ;;  %vm1847_vm8 = vcmp.gt.f32.partialorder %v4305_v24, 0.5  ;;  %vm1848_vm9 = vcmp.gt.f32.partialorder %v4306_v9, 0.5  ;;  %v4307_v51 = vld [vmem:[#allocation23_spill] sm:$0xff]  ;;  %vm1856_vm1 = vcmp.gt.f32.partialorder %v3785_v2, 0.5 }
 0x299   : > { %v2098_v13 = vadd.f32 %v2097_v55, %v2035_v11  ;;  %vm1846_vm10 = vcmp.gt.f32.partialorder %v4307_v51, 0.5 }
 0x29b   : > { %v2099_v39 = vadd.f32 %v2098_v13, %v2036_v35  ;;  %v4304_v35 = vld [vmem:[#allocation22_spill] sm:$0xff] }
 0x29c   : > { %vm1845_vm7 = vcmp.gt.f32.partialorder %v4304_v35, 0.5 }
 0x29d   : > { %v2100_v28 = vadd.f32 %v2099_v39, %v2037_v14 }
 0x29f   : > { %v2962_v15 = vpop.f32.mrb[48].mxu1 }
 0x2a0   : > { %v1675_v46 = vadd.f32 %v2962_v15, %v3730_v4  ;;  %v1666_v19 = vpop.f32.mrb[49].mxu1 }
 0x2a1   : > { %v1667_v1 = vadd.f32 %v3730_v4, %v1666_v19  ;;  %v2963_v18 = vpop.f32.mrb[50].mxu1 }
 0x2a2   : > { %v1779_v34 = vmax.f32 %v1675_v46, 0.0  ;;  %v1678_v40 = vadd.f32 %v2963_v18, %v3730_v4  ;;  %v1669_v26 = vpop.f32.mrb[51].mxu1 }
 0x2a3   : > { %v1777_v54 = vmax.f32 %v1667_v1, 0.0  ;;  %v1670_v50 = vadd.f32 %v3730_v4, %v1669_v26 }
 0x2a4   : > { %v1907_v45 = vsel %vm1843_vm3, %v1779_v34, -1e+30  ;;  %v2040_v32 = vmul.f32 %v1779_v34, %v4301_v59  ;;  %v1780_v43 = vmax.f32 %v1678_v40, 0.0  ;;  %v3146_v40 = vld [vmem:[%s4224_s6] ss:$0 sm:$0xff] }
 0x2a5   : > { %v4017_v57 = vmax.f32 %v1963_v25, %v1907_v45  ;;  %v1905_v0 = vsel %vm1841_vm2, %v1777_v54, -1e+30  ;;  %v2038_v60 = vmul.f32 %v1777_v54, %v4300_v16  ;;  %v1778_v12 = vmax.f32 %v1670_v50, 0.0 }
 0x2a6   : > { %v4021_v52 = vmax.f32 %v1961_v5, %v1905_v0  ;;  %v1908_v49 = vsel %vm1844_vm4, %v1780_v43, -1e+30  ;;  %v2041_v48 = vmul.f32 %v1780_v43, %v4302_v29  ;;  %v4309_v43 = vld [vmem:[#allocation28_spill] sm:$0xff]  ;;  %vm1854_vm2 = vcmp.gt.f32.partialorder %v3765_v53, 0.5 }
 0x2a7   : > { %v2101_v23 = vadd.f32 %v2100_v28, %v2038_v60  ;;  %v4024_v58 = vmax.f32 %v1964_v61, %v1908_v49  ;;  %v1906_v3 = vsel %vm1842_vm6, %v1778_v12, -1e+30  ;;  %v2039_v47 = vmul.f32 %v1778_v12, %v4303_v41  ;;  %v4310_v60 = vld [vmem:[#allocation29_spill] sm:$0xff] }
 0x2a8   : > { %v4027_v38 = vmax.f32 %v1962_v27, %v1906_v3  ;;  %vm1851_vm12 = vcmp.gt.f32.partialorder %v4309_v43, 0.5  ;;  %vm1852_vm13 = vcmp.gt.f32.partialorder %v4310_v60, 0.5  ;;  %v4311_v3 = vld [vmem:[#allocation27_spill] sm:$0xff]  ;;  %vm2278_vm6 = vcmask 1043456  }
 0x2a9   : > { %v2102_v42 = vadd.f32 %v2101_v23, %v2039_v47  ;;  %vm1850_vm14 = vcmp.gt.f32.partialorder %v4311_v3, 0.5 }
 0x2ab   : > { %v2103_v31 = vadd.f32 %v2102_v42, %v2040_v32  ;;  %v4308_v32 = vld [vmem:[#allocation26_spill] sm:$0xff] }
 0x2ac   : > { %vm1849_vm11 = vcmp.gt.f32.partialorder %v4308_v32, 0.5 }
 0x2ad   : > { %v2104_v6 = vadd.f32 %v2103_v31, %v2041_v48 }
 0x2af   : > { %v2966_v37 = vpop.f32.mrb[52].mxu1 }
 0x2b0   : > { %v1691_v7 = vadd.f32 %v2966_v37, %v3730_v4  ;;  %v1682_v20 = vpop.f32.mrb[53].mxu1 }
 0x2b1   : > { %v1683_v30 = vadd.f32 %v3730_v4, %v1682_v20  ;;  %v2967_v44 = vpop.f32.mrb[54].mxu1 }
 0x2b2   : > { %v1783_v36 = vmax.f32 %v1691_v7, 0.0  ;;  %v1694_v21 = vadd.f32 %v2967_v44, %v3730_v4  ;;  %v1685_v63 = vpop.f32.mrb[55].mxu1 }
 0x2b3   : > { %v1781_v25 = vmax.f32 %v1683_v30, 0.0  ;;  %v1686_v17 = vadd.f32 %v3730_v4, %v1685_v63 }
 0x2b4   : > { %v1911_v33 = vsel %vm1847_vm8, %v1783_v36, -1e+30  ;;  %v2044_v62 = vmul.f32 %v1783_v36, %v4305_v24  ;;  %v1784_v5 = vmax.f32 %v1694_v21, 0.0  ;;  %vm2341_vm8 = vcmask 261120  }
 0x2b5   : > { %v1971_v10 = vmax.f32 %v4017_v57, %v1911_v33  ;;  %v1909_v14 = vsel %vm1845_vm7, %v1781_v25, -1e+30  ;;  %v2042_v55 = vmul.f32 %v1781_v25, %v4304_v35  ;;  %v1782_v61 = vmax.f32 %v1686_v17, 0.0 }
 0x2b6   : > { %v1969_v11 = vmax.f32 %v4021_v52, %v1909_v14  ;;  %v1912_v27 = vsel %vm1848_vm9, %v1784_v5, -1e+30  ;;  %v2045_v13 = vmul.f32 %v1784_v5, %v4306_v9  ;;  %vm2274_vm7 = vcmask 64512  }
 0x2b7   : > { %v2105_v4 = vadd.f32 %v2104_v6, %v2042_v55  ;;  %v1972_v39 = vmax.f32 %v4024_v58, %v1912_v27  ;;  %v1910_v28 = vsel %vm1846_vm10, %v1782_v61, -1e+30  ;;  %v2043_v15 = vmul.f32 %v1782_v61, %v4307_v51 }
 0x2b8   : > { %v1970_v46 = vmax.f32 %v4027_v38, %v1910_v28  ;;  %vm2631_vm9 = vcmask 319488  }
 0x2b9   : > { %v2106_v19 = vadd.f32 %v2105_v4, %v2043_v15 }
 0x2bb   : > { %v2107_v1 = vadd.f32 %v2106_v19, %v2044_v62 }
 0x2bd   : > { %v2108_v18 = vadd.f32 %v2107_v1, %v2045_v13 }
 0x2bf   : > { %v2970_v34 = vpop.f32.mrb[56].mxu1 }
 0x2c0   : > { %v1707_v26 = vadd.f32 %v3146_v40, %v2970_v34  ;;  %v1698_v16 = vpop.f32.mrb[57].mxu1 }
 0x2c1   : > { %v1699_v59 = vadd.f32 %v3146_v40, %v1698_v16  ;;  %v2971_v54 = vpop.f32.mrb[58].mxu1 }
 0x2c2   : > { %v1787_v50 = vmax.f32 %v1707_v26, 0.0  ;;  %v1710_v29 = vadd.f32 %v3146_v40, %v2971_v54  ;;  %v1701_v45 = vpop.f32.mrb[59].mxu1 }
 0x2c3   : > { %v1785_v57 = vmax.f32 %v1699_v59, 0.0  ;;  %v1702_v0 = vadd.f32 %v3146_v40, %v1701_v45  ;;  %v2138_v59 = vld [vmem:[%s639_s20] sm:$0x1]  ;;  %s3147_s20 = scalar_lea.vmem %s4173_s0, 16 }
 0x2c4   : > { %v1915_v12 = vsel %vm1851_vm12, %v1787_v50, -1e+30  ;;  %v2048_v41 = vmul.f32 %v1787_v50, %v4309_v43  ;;  %v1788_v52 = vmax.f32 %v1710_v29, 0.0  ;;  %v2141_v29 = vmax.f32 %v2138_v59, 1e-06  ;;  %p3148_p12 = scmp.ne.s32.totalorder %s4173_s0, %s3147_s20  ;;  %p3155_p2 = scmp.lt.s32.totalorder %s3153_s21, %s3147_s20 }
 0x2c5   : > { %v1975_v49 = vmax.f32 %v1971_v10, %v1915_v12  ;;  %v1913_v48 = vsel %vm1849_vm11, %v1785_v57, -1e+30  ;;  %v2046_v23 = vmul.f32 %v1785_v57, %v4308_v32  ;;  %v1786_v58 = vmax.f32 %v1702_v0, 0.0 }
 0x2c6   : > { %v1973_v47 = vmax.f32 %v1969_v11, %v1913_v48  ;;  %v1916_v38 = vsel %vm1852_vm13, %v1788_v52, -1e+30  ;;  %v2049_v42 = vmul.f32 %v1788_v52, %v4310_v60  ;;  %3144 = vrcp.f32 %v2141_v29  ;;  %v2129_v60 = vld [vmem:[#allocation2] sm:$0x1]  ;;  %v3141_v29 = vld [vmem:[%s4234_s16 + $0x8] sm:$0xff]   ;;  %p3149_p13 = pnand %p3148_p12, %p3367_p4  ;;  %p3156_p3 = por %p3155_p2, %p3154_p1 }
 0x2c7   : > { %v2109_v31 = vadd.f32 %v2108_v18, %v2046_v23  ;;  %v1976_v6 = vmax.f32 %v1972_v39, %v1916_v38  ;;  %v1914_v37 = vsel %vm1850_vm14, %v1786_v58, -1e+30  ;;  %v2047_v7 = vmul.f32 %v1786_v58, %v4311_v3 }
 0x2c8   : > { %v1974_v20 = vmax.f32 %v1970_v46, %v1914_v37  ;;  %v2148_v52 = vlaneseq  ;;  %vm2139_vm3 = vcmp.gt.f32.partialorder %v2138_v59, 0.5  ;;  %v2272_v37 = vld [vmem:[%s4227_s9] sm:$0xf]  ;;  %p3150_p0 = pneg %p3149_p13 }
 0x2c9   : > { %v2110_v30 = vadd.f32 %v2109_v31, %v2047_v7 }
 0x2ca   : > { %v2149_v58 = vand.u32 127, %v2148_v52  ;;  %p3157_p5 = pnand %p3156_p3, %p3150_p0 }
 0x2cb   : > { %v2111_v44 = vadd.f32 %v2110_v30, %v2048_v41  ;;  %v2132_v41 = vld [vmem:[#allocation3] sm:$0x1] }
 0x2cd   : > { %v2112_v36 = vadd.f32 %v2111_v44, %v2049_v42  ;;  %v2280_v44 = vsel %vm2278_vm6, %v2272_v37, 0 }
 0x2cf   : > { %v2974_v21 = vpop.f32.mrb[60].mxu1 }
 0x2d0   : > { %v1723_v63 = vadd.f32 %v3146_v40, %v2974_v21  ;;  %v1714_v35 = vpop.f32.mrb[61].mxu1  ;;  %v3145_v3 = vpop.eup %3144 }
 0x2d1   : > { %v1715_v24 = vadd.f32 %v3146_v40, %v1714_v35  ;;  %v2975_v25 = vpop.f32.mrb[62].mxu1  ;;  %v2144_v38 = vsel %vm2139_vm3, %v3145_v3, 0.0  ;;  %v3129_v35 = vld [vmem:[%s4229_s11 + $0x8] sm:$0xff]  }
 0x2d2   : > { %v1791_v17 = vmax.f32 %v1723_v63, 0.0  ;;  %v1726_v9 = vadd.f32 %v3146_v40, %v2975_v25  ;;  %v1717_v33 = vpop.f32.mrb[63].mxu1  ;;  %v3128_v63 = vld [vmem:[%s4229_s11] sm:$0xff]  }
 0x2d3   : > { %v1789_v62 = vmax.f32 %v1715_v24, 0.0  ;;  %v1718_v5 = vadd.f32 %v3146_v40, %v1717_v33  ;;  %v2273_v33 = vld [vmem:[%s4228_s10] sm:$0x1] }
 0x2d4   : > { %v1919_v10 = vsel %vm1855_vm0, %v1791_v17, -1e+30  ;;  %v2052_v14 = vmul.f32 %v1791_v17, %v3776_v56  ;;  %v1792_v55 = vmax.f32 %v1726_v9, 0.0 }
 0x2d5   : > { %v1979_v61 = vmax.f32 %v1975_v49, %v1919_v10  ;;  %v1917_v51 = vsel %vm1853_vm15, %v1789_v62, -1e+30  ;;  %v2050_v11 = vmul.f32 %v1789_v62, %v3762_v22  ;;  %v1790_v27 = vmax.f32 %v1718_v5, 0.0 }
 0x2d6   : > { %v1977_v13 = vmax.f32 %v1973_v47, %v1917_v51  ;;  %v1920_v4 = vsel %vm1856_vm1, %v1792_v55, -1e+30  ;;  %v2053_v39 = vmul.f32 %v1792_v55, %v3785_v2  ;;  %v2154_v47 = vand.u32 31, %v2149_v58  ;;  %v3130_v51 = vld [vmem:[%s4232_s14] sm:$0xff]  }
 0x2d7   : > { %v2113_v28 = vadd.f32 %v2112_v36, %v2050_v11  ;;  %v1980_v15 = vmax.f32 %v1976_v6, %v1920_v4  ;;  %v1918_v46 = vsel %vm1854_vm2, %v1790_v27, -1e+30  ;;  %v2051_v19 = vmul.f32 %v1790_v27, %v3765_v53  ;;  %v2270_v36 = vld [vmem:[%s642_s1] sm:$0x1]  ;;  %v3131_v27 = vld [vmem:[%s4232_s14 + $0x8] sm:$0xff]   ;;  %v3133_v4 = vld [vmem:[%s4232_s14 + $0x18] sm:$0xff]  }
 0x2d8   : > { %v1978_v1 = vmax.f32 %v1974_v20, %v1918_v46  ;;  %vm2162_vm4 = vcmp.lt.s32.totalorder %v2154_v47, 16  ;;  %v2271_v21 = vpack.c.bf16 %v2270_v36, %v2270_v36  ;;  %v2181_v46 = vld [vmem:[%s4226_s8] sm:$0x1] }
 0x2d9   : > { %v1982_v56 = vmax.f32 %v1979_v61, %v1980_v15  ;;  %v2114_v18 = vadd.f32 %v2113_v28, %v2051_v19  ;;  %v3135_v28 = vld [vmem:[%s4232_s14 + $0x28] sm:$0xff]   ;;  %v3136_v15 = vld [vmem:[%s4232_s14 + $0x30] sm:$0xff]   ;;  %v3137_v19 = vld [vmem:[%s4232_s14 + $0x38] sm:$0xff]  }
 0x2da   : > { %v1981_v34 = vmax.f32 %v1977_v13, %v1978_v1  ;;  %v3132_v13 = vld [vmem:[%s4232_s14 + $0x10] sm:$0xff]  }
 0x2db   : > { %v2115_v40 = vadd.f32 %v2114_v18, %v2052_v14 }
 0x2dc   : > { %v1983_v22 = vmax.f32 %v1981_v34, %v1982_v56  ;;  %v3138_v56 = vld [vmem:[%s4231_s13] sm:$0xff]   ;;  %v3139_v34 = vld [vmem:[%s4231_s13 + $0x8] sm:$0xff]  }
 0x2dd   : > { %v2116_v26 = vadd.f32 %v2115_v40, %v2053_v39  ;;  %v3134_v39 = vld [vmem:[%s4232_s14 + $0x20] sm:$0xff]  }
 0x2de   : > { %v1984_v16 = vrot.slane %v1983_v22, 4  ;;  %v2328_v40 = vld [vmem:[%s4230_s12] sm:$0x1] }
 0x2df   : > { %v2117_v54 = vrot.slane %v2116_v26, 4 }
 0x2e0   : > { %v1985_v2 = vmax.f32 %v1983_v22, %v1984_v16 }
 0x2e1   : > { %v2118_v50 = vadd.f32 %v2117_v54, %v2116_v26  ;;  %v3140_v54 = vld [vmem:[%s4234_s16] sm:$0xff]  }
 0x2e2   : > { %v1986_v45 = vrot.slane %v1985_v2, 2 }
 0x2e3   : > { %v2119_v32 = vrot.slane %v2118_v50, 2 }
 0x2e4   : > { %v1987_v53 = vmax.f32 %v1985_v2, %v1986_v45 }
 0x2e5   : > { %v2120_v43 = vadd.f32 %v2119_v32, %v2118_v50 }
 0x2e6   : > { %v1988_v57 = vrot.slane %v1987_v53, 1 }
 0x2e7   : > { %v2121_v0 = vrot.slane %v2120_v43, 1 }
 0x2e8   : > { %v1989_v12 = vmax.f32 %v1987_v53, %v1988_v57  ;;  %v3142_v57 = vld [vmem:[%s4234_s16 + $0x10] sm:$0xff]  }
 0x2e9   : > { %v2122_v49 = vadd.f32 %v2121_v0, %v2120_v43  ;;  %v3143_v0 = vld [vmem:[%s4234_s16 + $0x18] sm:$0xff]  }
 0x2ea   : > { %v2130_v48 = vmax.f32 %v2129_v60, %v1989_v12  ;;  %v2550_v12 = vld [vmem:[%s4233_s15] sm:$0x1] }
 0x2eb   : > { %v2133_v23 = vadd.f32 %v2132_v41, %v2122_v49 }
 0x2ec   : > { %2131 = vst [vmem:[#allocation2] sm:$0x1] %v2130_v48 }
 0x2ed   : > { %2134 = vst [vmem:[#allocation3] sm:$0x1] %v2133_v23 }
 0x2f3   : > { %v2146_v42 = vld [vmem:[#allocation2] sm:$0x1] }
 0x2f4   : > { %v2140_v31 = vld [vmem:[#allocation3] sm:$0x1]  ;;  %v2147_v7 = vsel %vm2139_vm3, %v2146_v42, 0.0 }
 0x2f5   : > { %v2145_v6 = vmul.f32 %v2144_v38, %v2140_v31 }
 0x2f7   : > { %v2163_v20 = vsel %vm2162_vm4, %v2147_v7, %v2145_v6 }
 0x2f8   : > { %v2164_v30 = vpack.c.bf16 %v2163_v20, %v2163_v20 }
 0x2fa   : > { %2993 = vmatmul.mubr.bf16.vlgmr.msra.gmra.mrb[64].mxu1 %v2164_v30 }
 0x2fb   : > { %2997 = vmatpush3.bf16.msra.mxu1 %v2280_v44  ;;  %2998 = vmatprep.mubr.msk.bf16.mxu1 %vm3230_vm5, %v3228_v8 }
 0x2fc   : > { %3002 = vmatprep.subr.bf16.mxu1 %v3228_v8 }
 0x302   : > { %2999 = vmatmul.mubr.msk.bf16.vlgmr.msra.gmra.mrb[68].mxu1 %vm2274_vm7, %v2271_v21 }
 0x303   : > { %3006 = vmatprep.mubr.msk.bf16.mxu1 %vm3230_vm5, %v3228_v8  ;;  %3003 = vmatpush3.bf16.msra.mxu1 %v3128_v63 }
 0x304   : > { %3004 = vmatprep.subr.bf16.mxu1 %v3228_v8 }
 0x307   : > { %3005 = vmatpush3.bf16.msra.mxu1 %v3129_v35 }
 0x308   : > { %3010 = vmatprep.subr.bf16.mxu1 %v3228_v8 }
 0x3cd   : > { %v2264_v24 = vpop.f32.mrb[64].mxu1 }
 0x3ce   : > { %v2994_v25 = vpop.f32.mrb[65].mxu1  ;;  %v2265_v1 = vadd.f32 %v2264_v24, %v2181_v46 }
 0x3cf   : > { %v2267_v17 = vpop.f32.mrb[66].mxu1 }
 0x3d0   : > { %v2995_v9 = vpop.f32.mrb[67].mxu1  ;;  %v2390_v18 = vpack.c.bf16 %v2265_v1, %v2265_v1 }
 0x3d5   : > { %v2316_v62 = vpop.f32.mrb[68].mxu1 }
 0x3d6   : > { %v2317_v5 = vadd.f32 %v2316_v62, %v2273_v33  ;;  %v3000_v10 = vpop.f32.mrb[69].mxu1 }
 0x3d7   : > { %v2319_v14 = vpop.f32.mrb[70].mxu1 }
 0x3d8   : > { %v2322_v55 = vmax.f32 %v2317_v5, 0.0  ;;  %v3001_v61 = vpop.f32.mrb[71].mxu1 }
 0x3da   : > { %v2323_v11 = vpack.c.bf16 %v2322_v55, %v2322_v55 }
 0x3dc   : > { %3007 = vmatmul.mubr.msk.bf16.vlgmr.msra.gmra.mrb[72].mxu1 %vm2341_vm8, %v2323_v11 }
 0x3dd   : > { %3011 = vmatpush3.bf16.msra.mxu1 %v3130_v51  ;;  %3026 = vmatprep.mubr.msk.bf16.mxu1 %vm3230_vm5, %v3228_v8 }
 0x3de   : > { %3012 = vmatprep.subr.bf16.mxu1 %v3228_v8 }
 0x3e1   : > { %3013 = vmatpush3.bf16.msra.mxu1 %v3131_v27 }
 0x3e2   : > { %3014 = vmatprep.subr.bf16.mxu1 %v3228_v8 }
 0x3e5   : > { %3015 = vmatpush3.bf16.msra.mxu1 %v3132_v13 }
 0x3e6   : > { %3016 = vmatprep.subr.bf16.mxu1 %v3228_v8 }
 0x3e9   : > { %3017 = vmatpush3.bf16.msra.mxu1 %v3133_v4 }
 0x3ea   : > { %3018 = vmatprep.subr.bf16.mxu1 %v3228_v8 }
 0x3ed   : > { %3019 = vmatpush3.bf16.msra.mxu1 %v3134_v39 }
 0x3ee   : > { %3020 = vmatprep.subr.bf16.mxu1 %v3228_v8 }
 0x3f1   : > { %3021 = vmatpush3.bf16.msra.mxu1 %v3135_v28 }
 0x3f2   : > { %3022 = vmatprep.subr.bf16.mxu1 %v3228_v8 }
 0x3f5   : > { %3023 = vmatpush3.bf16.msra.mxu1 %v3136_v15 }
 0x3f6   : > { %3024 = vmatprep.subr.bf16.mxu1 %v3228_v8 }
 0x3f9   : > { %3025 = vmatpush3.bf16.msra.mxu1 %v3137_v19 }
 0x3fa   : > { %3030 = vmatprep.subr.bf16.mxu1 %v3228_v8 }
 0x3fc   : > { %3027 = vmatmul.mubr.bf16.vlgmr.msra.gmra.mrb[76].mxu1 %v2390_v18 }
 0x3fd   : > { %3031 = vmatpush3.bf16.msra.mxu1 %v3138_v56  ;;  %3034 = vmatprep.mubr.msk.bf16.mxu1 %vm3230_vm5, %v3228_v8 }
 0x3fe   : > { %3032 = vmatprep.subr.bf16.mxu1 %v3228_v8 }
 0x401   : > { %3033 = vmatpush3.bf16.msra.mxu1 %v3139_v34 }
 0x402   : > { %3038 = vmatprep.subr.bf16.mxu1 %v3228_v8 }
 0x4af   : > { %v2379_v22 = vpop.f32.mrb[72].mxu1 }
 0x4b0   : > { %v2380_v26 = vadd.f32 %v2379_v22, %v2328_v40  ;;  %v3008_v16 = vpop.f32.mrb[73].mxu1 }
 0x4b1   : > { %v2382_v59 = vpop.f32.mrb[74].mxu1 }
 0x4b2   : > { %v2385_v2 = vpack.c.bf16 %v2380_v26, %v2380_v26  ;;  %v3009_v50 = vpop.f32.mrb[75].mxu1 }
 0x4b4   : > { %3035 = vmatmul.mubr.msk.bf16.vlgmr.msra.gmra.mrb[80].mxu1 %vm2341_vm8, %v2385_v2 }
 0x4b5   : > { %3039 = vmatpush3.bf16.msra.mxu1 %v3140_v54  ;;  %3046 = vmatprep.mubr.msk.bf16.mxu1 %vm3230_vm5, %v3228_v8  ;;  %vm2587_vm5 = vcmask 523264  }
 0x4b6   : > { %3040 = vmatprep.subr.bf16.mxu1 %v3228_v8 }
 0x4b9   : > { %3041 = vmatpush3.bf16.msra.mxu1 %v3141_v29 }
 0x4ba   : > { %3042 = vmatprep.subr.bf16.mxu1 %v3228_v8 }
 0x4bd   : > { %3043 = vmatpush3.bf16.msra.mxu1 %v3142_v57 }
 0x4be   : > { %3044 = vmatprep.subr.bf16.mxu1 %v3228_v8  ;;  %v2562_v8 = vld [vmem:[%s4235_s17] sm:$0x1] }
 0x4c1   : > { %3045 = vmatpush3.bf16.msra.mxu1 %v3143_v0 }
 0x4cf   : > { %v2489_v45 = vpop.f32.mrb[76].mxu1 }
 0x4d0   : > { %v3028_v32 = vpop.f32.mrb[77].mxu1 }
 0x4d1   : > { %v2492_v53 = vpop.f32.mrb[78].mxu1 }
 0x4d2   : > { %v3029_v43 = vpop.f32.mrb[79].mxu1 }
 0x587   : > { %v2544_v60 = vpop.f32.mrb[80].mxu1 }
 0x588   : > { %v2545_v41 = vadd.f32 %v2544_v60, %v2489_v45  ;;  %v3036_v52 = vpop.f32.mrb[81].mxu1 }
 0x589   : > { %v2547_v49 = vpop.f32.mrb[82].mxu1 }
 0x58a   : > { %v2551_v48 = vadd.f32 %v2550_v12, %v2545_v41  ;;  %v3037_v23 = vpop.f32.mrb[83].mxu1 }
 0x58c   : > { %v2552_v58 = vmax.f32 %v2551_v48, 0.0 }
 0x58e   : > { %v2553_v3 = vpack.c.bf16 %v2552_v58, %v2552_v58 }
 0x590   : > { %3047 = vmatmul.mubr.msk.bf16.vlgmr.msra.gmra.mrb[84].mxu1 %vm2587_vm5, %v2553_v3 }
 0x663   : > { %v2625_v47 = vpop.f32.mrb[84].mxu1 }
 0x664   : > { %v2626_v38 = vadd.f32 %v2625_v47, %v2562_v8  ;;  %v3048_v42 = vpop.f32.mrb[85].mxu1 }
 0x665   : > { %v2628_v31 = vpop.f32.mrb[86].mxu1 }
 0x666   : > { %v3049_v6 = vpop.f32.mrb[87].mxu1  ;;  %2632 = vst.msk [vmem:[%s623_s26] sm:$0x1] %vm2631_vm9, %v2626_v38 }
 0x667   : > { %3160 = shalt.err (!%p3157_p5)
}
 0x668   : > { %s3161_s25 = scalar_lea.hbm %s4171_s3, 16  ;;  %s3165_s1 = scalar_lea.hbm %s4236_s18, 32 }
 0x669   : > { %p3162_p6 = scmp.ne.s32.totalorder %s4171_s3, %s3161_s25  ;;  %p3166_p10 = scmp.lt.u32.totalorder %s4171_s3, %s4236_s18 }
 0x66a   : > { %p3167_p11 = scmp.lt.u32.totalorder %s3165_s1, %s3161_s25  ;;  %p3169_p13 = scmp.lt.u32.totalorder %s3161_s25, %s4171_s3 }
 0x66b   : > { %p3163_p7 = pnand %p3162_p6, %p3367_p4 }
 0x66c   : > { %p3168_p12 = por %p3167_p11, %p3166_p10 }
 0x66d   : > { %p3164_p9 = pneg %p3163_p7 }
 0x66e   : > { %p3170_p0 = por %p3169_p13, %p3168_p12 }
 0x670   : > { %p3171_p1 = pnand %p3170_p0, %p3164_p9 }
 0x672   : > { %3174 = shalt.err (!%p3171_p1)
}
 0x673   : > { %3050 = dma.vmem_to_hbm [thread:$0]  (%p3367_p4), %s4173_s0, 16, %s4171_s3, %s2634_s30  }
 0x674 PF: > { %p3056_p2 = scmp.ge.s32.totalorder %s3225_s19, 2  ;;  %s2658_s20 = sand.u32 1, %s3205_s27  }
 0x675   : > { %s2659_s21 = scalar_lea.sflag [#allocation5], %s2658_s20 }
 0x676   : > { %p3053_p3 = pnand %p3056_p2, %p3374_p8 }
 0x678   : > { %3200 = dma.done.wait (!%p3053_p3), %s2659_s21, 16  }
 0x679   : > { %3202 = vsyncadd (!%p3053_p3), %s2659_s21, 4294967280  ;;  %s31_s19 = sadd.s32 1, %s3225_s19   ;;  %s4314_s2 = sld [smem:[#allocation9_spill]] }
 0x67a   : > { %p28_p5 = scmp.ge.s32.totalorder %s31_s19, 4   ;;  %s4315_s30 = sld [smem:[#allocation7_spill]] }
 0x67b   : > { %s4316_s0 = sld [smem:[#allocation8_spill]]  ;;  %s4317_s27 = smov %s3209_s28 }
 0x67c   : > { %s4318_s28 = smov %s3213_s29  ;;  %30 = sbr.rel (!%p28_p5) target bundleno = 10 (0xa), region = 144 }
 0x67f   : > { %s4319_s29 = smov %s4314_s2 }
 0x683   :  { %2663 = vsyncpa [#allocation5], 1 }
 0x684   :  { %2665 = vsyncpa [#allocation5 + $0x1], 1 }

</bundles_post_ra>
